<compile_context>
chip_gen: v5e
topology: v5e:2x2
jax: 0.10.0
libtpu: 0.0.40
codegen_flags: <defaults>
</compile_context>

<pallas_src>
import functools
import math

import jax
import jax.numpy as jnp
from jax.experimental import pallas as pl
from jax.experimental.pallas import tpu as pltpu

NEG_SLOPE = 0.1
BN_EPS = 1e-5
LANE = 128


def _round_up(v, m):
    return (v + m - 1) // m * m


def _select_tiling(cout_p):
    """Per-generation Cout tile width and VMEM limit (Cout tiling + vmem cap items)."""
    try:
        kind = jax.devices()[0].device_kind.lower()
    except Exception:
        kind = ""
    if "v5" in kind or "v6" in kind:
        tn_target, vmem = 512, 96 * 1024 * 1024      # 128 MiB physical VMEM
    elif "7" in kind:
        tn_target, vmem = 256, 48 * 1024 * 1024      # v7x: 64 MiB per TensorCore
    else:
        tn_target, vmem = 256, 64 * 1024 * 1024
    tn = min(cout_p, tn_target)
    while cout_p % tn:                               # tn stays a multiple of 128
        tn -= LANE
    return tn, vmem


# ------------------------------ Pallas kernels --------------------------------

def _make_conv3x3_kernel(offsets, m, res_mode, emit_moments):
    """9-tap MXU conv with fused residual epilogue and optional f32 moment outputs.

    The input ref holds the pre-activated, zero-padded bf16 tap stack flattened to
    (1, R, Cin); `offsets` are static row starts, so every tap window
    x_ref[0, off:off+m] is a contiguous (m, Cin) slab (no in-kernel relayout / cast).
    """
    n_in = 2 + {"direct": 1, "matmul": 2}.get(res_mode, 0)

    def kernel(*refs):
        x_ref, w_ref = refs[0], refs[1]
        acc_ref = refs[-1]                       # f32 VMEM scratch accumulator
        out_refs = refs[n_in:-1]
        o_ref = out_refs[0]

        # Unrolled 9-tap conv: bf16 operands on the MXU, f32 accumulation in VMEM
        # scratch (first tap writes, the rest accumulate in place).
        for t, off in enumerate(offsets):
            win = x_ref[0, off:off + m]          # (m, Cin) bf16, contiguous view
            d = jnp.dot(win, w_ref[t], preferred_element_type=jnp.float32)
            if t == 0:
                acc_ref[...] = d
            else:
                acc_ref[...] += d

        # Fused residual epilogue.
        if res_mode == "direct":                 # identity shortcut tile (f32)
            acc_ref[...] += refs[2][0].astype(jnp.float32)
        elif res_mode == "matmul":               # 1x1 stride-s shortcut conv
            xs_ref, ws_ref = refs[2], refs[3]
            acc_ref[...] += jnp.dot(xs_ref[0], ws_ref[...],
                                    preferred_element_type=jnp.float32)

        acc = acc_ref[...]
        o_ref[0] = acc.astype(o_ref.dtype)
        if emit_moments:                         # f32 per-channel moments for BN2 stats
            out_refs[1][0] = jnp.sum(acc, axis=0, keepdims=True)
            out_refs[2][0] = jnp.sum(acc * acc, axis=0, keepdims=True)

    return kernel


def _conv3x3_call(stack, w_taps, *, offsets, m, tn, vmem_limit, out_dtype,
                  emit_moments=False, res_mode=None, res=None, res_w=None):
    n, r_rows, cin_p = stack.shape
    cout_p = w_taps.shape[-1]
    nj = cout_p // tn

    in_specs = [
        pl.BlockSpec((1, r_rows, cin_p), lambda i, j: (i, 0, 0)),   # tap stack / image
        pl.BlockSpec((9, cin_p, tn), lambda i, j: (0, 0, j)),       # streamed Cout tile
    ]
    args = [stack, w_taps]
    if res_mode == "direct":
        in_specs.append(pl.BlockSpec((1, m, tn), lambda i, j: (i, 0, j)))
        args.append(res)
    elif res_mode == "matmul":
        cr = res_w.shape[0]
        in_specs += [pl.BlockSpec((1, m, cr), lambda i, j: (i, 0, 0)),
                     pl.BlockSpec((cr, tn), lambda i, j: (0, j))]
        args += [res, res_w]

    out_shape = [jax.ShapeDtypeStruct((n, m, cout_p), out_dtype)]
    out_specs = [pl.BlockSpec((1, m, tn), lambda i, j: (i, 0, j))]
    if emit_moments:
        out_shape += [jax.ShapeDtypeStruct((n, 1, cout_p), jnp.float32),
                      jax.ShapeDtypeStruct((n, 1, cout_p), jnp.float32)]
        out_specs += [pl.BlockSpec((1, 1, tn), lambda i, j: (i, 0, j)),
                      pl.BlockSpec((1, 1, tn), lambda i, j: (i, 0, j))]

    kernel = _make_conv3x3_kernel(tuple(offsets), m, res_mode, emit_moments)
    return pl.pallas_call(
        kernel,
        out_shape=tuple(out_shape),
        grid=(n, nj),
        in_specs=in_specs,
        out_specs=tuple(out_specs),
        scratch_shapes=[pltpu.VMEM((m, tn), jnp.float32)],
        compiler_params=pltpu.CompilerParams(
            dimension_semantics=("parallel", "parallel"),   # batch x Cout tiles
            vmem_limit_bytes=vmem_limit),
    )(*args)


# ------------------------------ wrapper helpers --------------------------------

def _fold(mean, var, gamma, beta, c_pad):
    c = gamma.shape[0]
    g = jnp.pad(gamma.astype(jnp.float32), (0, c_pad - c))
    b = jnp.pad(beta.astype(jnp.float32), (0, c_pad - c))
    mean = jnp.pad(mean, (0, c_pad - mean.shape[0]))
    var = jnp.pad(var, (0, c_pad - var.shape[0]))
    scale = g * jax.lax.rsqrt(var + BN_EPS)          # padded channels: gamma 0 -> scale 0
    bias = b - mean * scale
    return scale.reshape(1, 1, 1, c_pad), bias.reshape(1, 1, 1, c_pad)


def _bn_fold_stats(x, gamma, beta, c_pad):
    """Training-mode BN on NHWC x folded to per-channel (scale, bias), padded to c_pad."""
    xf = x.astype(jnp.float32)
    mean = jnp.mean(xf, axis=(0, 1, 2))
    var = jnp.var(xf, axis=(0, 1, 2))
    return _fold(mean, var, gamma, beta, c_pad)


def _bn_fold_from_moments(total_sum, total_sq, count, gamma, beta, c_pad):
    """BN fold from kernel-emitted f32 per-channel sum / sum-of-squares."""
    mean = total_sum / count
    var = jnp.maximum(total_sq / count - mean * mean, 0.0)
    return _fold(mean, var, gamma, beta, c_pad)


def _affine_lrelu(x, scale, bias):
    t = x * scale + bias
    return jnp.maximum(t, NEG_SLOPE * t)             # LeakyReLU(0.1)


def _build_tap_stack(x_act, stride, ho, wo, dtype):
    """Zero-pad spatially and pre-shift into 3*stride slabs so each conv tap window is a
    contiguous (ho*wo, C) row range of the flattened (N, R, C) result (no kernel-side
    W-offset slices or (ho, wo)->m relayouts)."""
    n, h, w, c = x_act.shape
    s = stride
    hps = ho + (2 if s == 1 else 1)
    xp = jnp.pad(x_act, ((0, 0), (1, 1), (1, 1), (0, 0)))   # exact zeros post-activation
    slabs = []
    for dx in range(3):                                     # slab index q = dx * s + py
        for py in range(s):
            slabs.append(xp[:, py::s, dx::s, :][:, :hps, :wo, :])
    stack = jnp.concatenate(slabs, axis=1).astype(dtype)    # (N, 3*s*hps, wo, C)
    return stack.reshape(n, 3 * s * hps * wo, c), hps


def _tap_offsets(stride, hps, wo):
    """Static flattened-row starts of the 9 tap windows, in (dy, dx) weight order."""
    offs = []
    for dy in range(3):
        for dx in range(3):
            q = dx * stride + dy % stride
            offs.append((q * hps + dy // stride) * wo)
    return offs


def _prep_conv3x3_w(w_oihw, cin_p, cout_p):
    cout, cin, kh, kw = w_oihw.shape
    wt = jnp.transpose(w_oihw, (2, 3, 1, 0))                # (kh, kw, cin, cout)
    wt = jnp.pad(wt, ((0, 0), (0, 0), (0, cin_p - cin), (0, cout_p - cout)))
    return wt.reshape(kh * kw, cin_p, cout_p).astype(jnp.bfloat16)


def _prep_conv1x1_w(w_oihw, cin_p, cout_p):
    cout, cin = w_oihw.shape[0], w_oihw.shape[1]
    wt = jnp.transpose(w_oihw[:, :, 0, 0], (1, 0))          # (cin, cout)
    wt = jnp.pad(wt, ((0, cin_p - cin), (0, cout_p - cout)))
    return wt.astype(jnp.bfloat16)


# --------------------------------- forward -------------------------------------

def basic_block_forward(x_nchw, params, *, stride, drop_rate=0.0,
                        activate_before_residual=False, out_dtype=jnp.float32):
    if drop_rate:
        # TODO(synk): training-mode dropout (drop_rate > 0) not implemented; the module
        #             default drop_rate=0.0 makes it an identity op.
        raise NotImplementedError("drop_rate > 0 is not supported")

    in_planes = x_nchw.shape[1]
    out_planes = params["conv1_w"].shape[0]
    equal_in_out = in_planes == out_planes
    assert stride in (1, 2)
    assert not (equal_in_out and stride != 1), \
        "identity residual requires stride 1 (torch would fail the add otherwise)"

    x = jnp.transpose(x_nchw, (0, 2, 3, 1)).astype(jnp.float32)         # NHWC f32
    n, h, w, cin = x.shape
    assert h % stride == 0 and w % stride == 0
    ho, wo = h // stride, w // stride
    m = ho * wo
    cin_p = _round_up(cin, LANE)
    cout_p = _round_up(out_planes, LANE)
    tn, vmem_limit = _select_tiling(cout_p)

    xc = jnp.pad(x, ((0, 0), (0, 0), (0, 0), (0, cin_p - cin)))         # lane-dense channels

    # BN1 (training-mode batch stats over the real channels) folded to scale/bias.
    s1, b1 = _bn_fold_stats(x, params["bn1_gamma"], params["bn1_beta"], cin_p)

    act1 = equal_in_out or activate_before_residual
    if act1:
        xa = _affine_lrelu(xc, s1, b1)      # fused by XLA into the stack build below
        conv1_in = xa
    else:
        # torch computes relu1(bn1(x)) here too but never uses it -> skipped.
        xa = None
        conv1_in = xc

    # ---- conv1: 3x3 / stride / pad=1 (input already activated & zero-padded) ----
    stack1, hps1 = _build_tap_stack(conv1_in, stride, ho, wo, jnp.bfloat16)
    offs1 = _tap_offsets(stride, hps1, wo)
    w1 = _prep_conv3x3_w(params["conv1_w"], cin_p, cout_p)
    c1, c1_sum, c1_sq = _conv3x3_call(
        stack1, w1, offsets=offs1, m=m, tn=tn, vmem_limit=vmem_limit,
        out_dtype=jnp.bfloat16, emit_moments=True)

    # ---- BN2 from the f32 moments emitted by the conv1 kernel (no extra pass over c1) ----
    count = n * m
    s2, b2 = _bn_fold_from_moments(jnp.sum(c1_sum, axis=(0, 1)),
                                   jnp.sum(c1_sq, axis=(0, 1)),
                                   count, params["bn2_gamma"], params["bn2_beta"], cout_p)

    # ---- conv2: 3x3 / stride 1 / pad=1, residual fused into the kernel epilogue ----
    c1a = _affine_lrelu(c1.reshape(n, ho, wo, cout_p).astype(jnp.float32), s2, b2)
    stack2, hps2 = _build_tap_stack(c1a, 1, ho, wo, jnp.bfloat16)
    offs2 = _tap_offsets(1, hps2, wo)
    w2 = _prep_conv3x3_w(params["conv2_w"], cout_p, cout_p)

    if equal_in_out:
        res = xc.reshape(n, m, cin_p)       # raw input, exact f32 identity add
        out = _conv3x3_call(stack2, w2, offsets=offs2, m=m, tn=tn, vmem_limit=vmem_limit,
                            out_dtype=out_dtype, res_mode="direct", res=res)[0]
    else:
        short_in = xa if activate_before_residual else xc
        xs = short_in[:, ::stride, ::stride, :].reshape(n, m, cin_p).astype(jnp.bfloat16)
        ws = _prep_conv1x1_w(params["convs_w"], cin_p, cout_p)
        out = _conv3x3_call(stack2, w2, offsets=offs2, m=m, tn=tn, vmem_limit=vmem_limit,
                            out_dtype=out_dtype, res_mode="matmul", res=xs, res_w=ws)[0]

    out = out.reshape(n, ho, wo, cout_p)[..., :out_planes]
    return jnp.transpose(out, (0, 3, 1, 2)).astype(out_dtype)           # back to NCHW


# ----------------------------- pure-JAX reference -------------------------------

def _reference_forward(x_nchw, params, *, stride, activate_before_residual):
    def bn(v, gamma, beta):
        mean = jnp.mean(v, axis=(0, 2, 3), keepdims=True)
        var = jnp.var(v, axis=(0, 2, 3), keepdims=True)
        return ((v - mean) / jnp.sqrt(var + BN_EPS)) * gamma.reshape(1, -1, 1, 1) \
            + beta.reshape(1, -1, 1, 1)

    def lrelu(v):
        return jnp.where(v >= 0, v, NEG_SLOPE * v)

    def conv(v, wgt, s, p):
        return jax.lax.conv_general_dilated(
            v, wgt, (s, s), [(p, p), (p, p)],
            dimension_numbers=("NCHW", "OIHW", "NCHW"))

    in_planes = x_nchw.shape[1]
    out_planes = params["conv1_w"].shape[0]
    equal_in_out = in_planes == out_planes
    x = x_nchw.astype(jnp.float32)

    if (not equal_in_out) and activate_before_residual:
        x = lrelu(bn(x, params["bn1_gamma"], params["bn1_beta"]))
        out = None
    else:
        out = lrelu(bn(x, params["bn1_gamma"], params["bn1_beta"]))
    out = lrelu(bn(conv(out if equal_in_out else x, params["conv1_w"], stride, 1),
                   params["bn2_gamma"], params["bn2_beta"]))
    out = conv(out, params["conv2_w"], 1, 1)
    shortcut = x if equal_in_out else conv(x, params["convs_w"], stride, 0)
    return shortcut + out


# -------------------------------- param init ------------------------------------

def init_params(key, in_planes, out_planes):
    ks = jax.random.split(key, 7)
    params = {
        "conv1_w": jax.random.normal(ks[0], (out_planes, in_planes, 3, 3), jnp.float32)
        * math.sqrt(2.0 / (9 * out_planes)),
        "conv2_w": jax.random.normal(ks[1], (out_planes, out_planes, 3, 3), jnp.float32)
        * math.sqrt(2.0 / (9 * out_planes)),
        "bn1_gamma": 1.0 + 0.1 * jax.random.normal(ks[2], (in_planes,), jnp.float32),
        "bn1_beta": 0.1 * jax.random.normal(ks[3], (in_planes,), jnp.float32),
        "bn2_gamma": 1.0 + 0.1 * jax.random.normal(ks[4], (out_planes,), jnp.float32),
        "bn2_beta": 0.1 * jax.random.normal(ks[5], (out_planes,), jnp.float32),
    }
    if in_planes != out_planes:
        params["convs_w"] = jax.random.normal(
            ks[6], (out_planes, in_planes, 1, 1), jnp.float32) * math.sqrt(2.0 / out_planes)
    return params


# ------------------------------------ main ---------------------------------------

if __name__ == "__main__":
    def check(name, in_planes, out_planes, stride, abr, key):
        kx, kp = jax.random.split(key)
        x = jax.random.normal(kx, (2, in_planes, 16, 16), jnp.float32)   # NCHW input
        params = init_params(kp, in_planes, out_planes)
        fwd = jax.jit(functools.partial(basic_block_forward, stride=stride,
                                        activate_before_residual=abr))
        out = jax.block_until_ready(fwd(x, params))
        ref = jax.block_until_ready(_reference_forward(
            x, params, stride=stride, activate_before_residual=abr))
        assert out.shape == ref.shape, (name, out.shape, ref.shape)
        err = float(jnp.max(jnp.abs(out - ref)))
        ref_max = float(jnp.max(jnp.abs(ref)))
        # bf16 MXU operands (f32 accumulation) -> looser tolerance than pure f32.
        if err > 5e-2 * max(1.0, ref_max):
            raise AssertionError(f"{name}: max abs err {err} (ref max {ref_max})")

    k1, k2 = jax.random.split(jax.random.PRNGKey(0))
    # Downsampling block: 1x1 stride-2 shortcut conv, activate_before_residual=True.
    check("conv_shortcut", 4, 8, 2, True, k1)
    # Identity-residual block: equal in/out channels, stride 1.
    check("identity", 8, 8, 1, False, k2)

    print("KERNEL_OK")
</pallas_src>

<mosaic_0001>
module attributes {stable_mosaic.version = 11 : i64} {
  func.func @kernel(%arg0: i32, %arg1: i32, %arg2: memref<1x432x128xbf16, #tpu.memory_space<vmem>>, %arg3: memref<9x128x128xbf16, #tpu.memory_space<vmem>>, %arg4: memref<1x64x128xbf16, #tpu.memory_space<vmem>>, %arg5: memref<1x1x128xf32, #tpu.memory_space<vmem>>, %arg6: memref<1x1x128xf32, #tpu.memory_space<vmem>>, %arg7: memref<64x128xf32, #tpu.memory_space<vmem>>) attributes {dimension_semantics = [#tpu.dimension_semantics<parallel>, #tpu.dimension_semantics<parallel>], iteration_bounds = array<i64: 2, 1>, scalar_prefetch = 0 : i64, scratch_operands = 1 : i64, tpu.core_type = #tpu.core_type<tc>, window_params = [{transform_indices = @transform_0, window_bounds = array<i64: 1, 432, 128>}, {transform_indices = @transform_1, window_bounds = array<i64: 9, 128, 128>}, {transform_indices = @transform_2, window_bounds = array<i64: 1, 64, 128>}, {transform_indices = @transform_3, window_bounds = array<i64: 1, 1, 128>}, {transform_indices = @transform_4, window_bounds = array<i64: 1, 1, 128>}]} {
    %c0 = arith.constant 0 : index
    %c0_0 = arith.constant 0 : index
    %c0_1 = arith.constant 0 : index
    %0 = vector.load %arg2[%c0, %c0_0, %c0_1] : memref<1x432x128xbf16, #tpu.memory_space<vmem>>, vector<1x64x128xbf16>
    %1 = vector.shape_cast %0 : vector<1x64x128xbf16> to vector<64x128xbf16>
    %c0_2 = arith.constant 0 : index
    %c0_3 = arith.constant 0 : index
    %c0_4 = arith.constant 0 : index
    %2 = vector.load %arg3[%c0_2, %c0_3, %c0_4] : memref<9x128x128xbf16, #tpu.memory_space<vmem>>, vector<1x128x128xbf16>
    %3 = vector.shape_cast %2 : vector<1x128x128xbf16> to vector<128x128xbf16>
    %cst = arith.constant dense<0.000000e+00> : vector<64x128xf32>
    %4 = tpu.matmul %1, %3, %cst {dimension_numbers = #tpu.dot_dimension_numbers<[1], [0], [0], [1], [0, 0, 1, 1], [], []>} : vector<64x128xbf16>, vector<128x128xbf16>, vector<64x128xf32> -> vector<64x128xf32>
    %c0_5 = arith.constant 0 : index
    %c0_6 = arith.constant 0 : index
    %5 = vector.load %arg7[%c0_5, %c0_6] : memref<64x128xf32, #tpu.memory_space<vmem>>, vector<64x128xf32>
    tpu.vector_store %arg7[%c0_5, %c0_6], %4 {strides = array<i32>} : memref<64x128xf32, #tpu.memory_space<vmem>>, vector<64x128xf32>,
    %c0_7 = arith.constant 0 : index
    %c144 = arith.constant 144 : index
    %c0_8 = arith.constant 0 : index
    %6 = vector.load %arg2[%c0_7, %c144, %c0_8] : memref<1x432x128xbf16, #tpu.memory_space<vmem>>, vector<1x64x128xbf16>
    %7 = vector.shape_cast %6 : vector<1x64x128xbf16> to vector<64x128xbf16>
    %c1 = arith.constant 1 : index
    %c0_9 = arith.constant 0 : index
    %c0_10 = arith.constant 0 : index
    %8 = vector.load %arg3[%c1, %c0_9, %c0_10] : memref<9x128x128xbf16, #tpu.memory_space<vmem>>, vector<1x128x128xbf16>
    %9 = vector.shape_cast %8 : vector<1x128x128xbf16> to vector<128x128xbf16>
    %cst_11 = arith.constant dense<0.000000e+00> : vector<64x128xf32>
    %10 = tpu.matmul %7, %9, %cst_11 {dimension_numbers = #tpu.dot_dimension_numbers<[1], [0], [0], [1], [0, 0, 1, 1], [], []>} : vector<64x128xbf16>, vector<128x128xbf16>, vector<64x128xf32> -> vector<64x128xf32>
    %c0_12 = arith.constant 0 : index
    %c0_13 = arith.constant 0 : index
    %11 = vector.load %arg7[%c0_12, %c0_13] : memref<64x128xf32, #tpu.memory_space<vmem>>, vector<64x128xf32>
    %12 = arith.addf %11, %10 : vector<64x128xf32>
    %c0_14 = arith.constant 0 : index
    %c0_15 = arith.constant 0 : index
    %13 = vector.load %arg7[%c0_14, %c0_15] : memref<64x128xf32, #tpu.memory_space<vmem>>, vector<64x128xf32>
    tpu.vector_store %arg7[%c0_14, %c0_15], %12 {strides = array<i32>} : memref<64x128xf32, #tpu.memory_space<vmem>>, vector<64x128xf32>,
    %c0_16 = arith.constant 0 : index
    %c288 = arith.constant 288 : index
    %c0_17 = arith.constant 0 : index
    %14 = vector.load %arg2[%c0_16, %c288, %c0_17] : memref<1x432x128xbf16, #tpu.memory_space<vmem>>, vector<1x64x128xbf16>
    %15 = vector.shape_cast %14 : vector<1x64x128xbf16> to vector<64x128xbf16>
    %c2 = arith.constant 2 : index
    %c0_18 = arith.constant 0 : index
    %c0_19 = arith.constant 0 : index
    %16 = vector.load %arg3[%c2, %c0_18, %c0_19] : memref<9x128x128xbf16, #tpu.memory_space<vmem>>, vector<1x128x128xbf16>
    %17 = vector.shape_cast %16 : vector<1x128x128xbf16> to vector<128x128xbf16>
    %cst_20 = arith.constant dense<0.000000e+00> : vector<64x128xf32>
    %18 = tpu.matmul %15, %17, %cst_20 {dimension_numbers = #tpu.dot_dimension_numbers<[1], [0], [0], [1], [0, 0, 1, 1], [], []>} : vector<64x128xbf16>, vector<128x128xbf16>, vector<64x128xf32> -> vector<64x128xf32>
    %c0_21 = arith.constant 0 : index
    %c0_22 = arith.constant 0 : index
    %19 = vector.load %arg7[%c0_21, %c0_22] : memref<64x128xf32, #tpu.memory_space<vmem>>, vector<64x128xf32>
    %20 = arith.addf %19, %18 : vector<64x128xf32>
    %c0_23 = arith.constant 0 : index
    %c0_24 = arith.constant 0 : index
    %21 = vector.load %arg7[%c0_23, %c0_24] : memref<64x128xf32, #tpu.memory_space<vmem>>, vector<64x128xf32>
    tpu.vector_store %arg7[%c0_23, %c0_24], %20 {strides = array<i32>} : memref<64x128xf32, #tpu.memory_space<vmem>>, vector<64x128xf32>,
    %c0_25 = arith.constant 0 : index
    %c72 = arith.constant 72 : index
    %c0_26 = arith.constant 0 : index
    %22 = vector.load %arg2[%c0_25, %c72, %c0_26] : memref<1x432x128xbf16, #tpu.memory_space<vmem>>, vector<1x64x128xbf16>
    %23 = vector.shape_cast %22 : vector<1x64x128xbf16> to vector<64x128xbf16>
    %c3 = arith.constant 3 : index
    %c0_27 = arith.constant 0 : index
    %c0_28 = arith.constant 0 : index
    %24 = vector.load %arg3[%c3, %c0_27, %c0_28] : memref<9x128x128xbf16, #tpu.memory_space<vmem>>, vector<1x128x128xbf16>
    %25 = vector.shape_cast %24 : vector<1x128x128xbf16> to vector<128x128xbf16>
    %cst_29 = arith.constant dense<0.000000e+00> : vector<64x128xf32>
    %26 = tpu.matmul %23, %25, %cst_29 {dimension_numbers = #tpu.dot_dimension_numbers<[1], [0], [0], [1], [0, 0, 1, 1], [], []>} : vector<64x128xbf16>, vector<128x128xbf16>, vector<64x128xf32> -> vector<64x128xf32>
    %c0_30 = arith.constant 0 : index
    %c0_31 = arith.constant 0 : index
    %27 = vector.load %arg7[%c0_30, %c0_31] : memref<64x128xf32, #tpu.memory_space<vmem>>, vector<64x128xf32>
    %28 = arith.addf %27, %26 : vector<64x128xf32>
    %c0_32 = arith.constant 0 : index
    %c0_33 = arith.constant 0 : index
    %29 = vector.load %arg7[%c0_32, %c0_33] : memref<64x128xf32, #tpu.memory_space<vmem>>, vector<64x128xf32>
    tpu.vector_store %arg7[%c0_32, %c0_33], %28 {strides = array<i32>} : memref<64x128xf32, #tpu.memory_space<vmem>>, vector<64x128xf32>,
    %c0_34 = arith.constant 0 : index
    %c216 = arith.constant 216 : index
    %c0_35 = arith.constant 0 : index
    %30 = vector.load %arg2[%c0_34, %c216, %c0_35] : memref<1x432x128xbf16, #tpu.memory_space<vmem>>, vector<1x64x128xbf16>
    %31 = vector.shape_cast %30 : vector<1x64x128xbf16> to vector<64x128xbf16>
    %c4 = arith.constant 4 : index
    %c0_36 = arith.constant 0 : index
    %c0_37 = arith.constant 0 : index
    %32 = vector.load %arg3[%c4, %c0_36, %c0_37] : memref<9x128x128xbf16, #tpu.memory_space<vmem>>, vector<1x128x128xbf16>
    %33 = vector.shape_cast %32 : vector<1x128x128xbf16> to vector<128x128xbf16>
    %cst_38 = arith.constant dense<0.000000e+00> : vector<64x128xf32>
    %34 = tpu.matmul %31, %33, %cst_38 {dimension_numbers = #tpu.dot_dimension_numbers<[1], [0], [0], [1], [0, 0, 1, 1], [], []>} : vector<64x128xbf16>, vector<128x128xbf16>, vector<64x128xf32> -> vector<64x128xf32>
    %c0_39 = arith.constant 0 : index
    %c0_40 = arith.constant 0 : index
    %35 = vector.load %arg7[%c0_39, %c0_40] : memref<64x128xf32, #tpu.memory_space<vmem>>, vector<64x128xf32>
    %36 = arith.addf %35, %34 : vector<64x128xf32>
    %c0_41 = arith.constant 0 : index
    %c0_42 = arith.constant 0 : index
    %37 = vector.load %arg7[%c0_41, %c0_42] : memref<64x128xf32, #tpu.memory_space<vmem>>, vector<64x128xf32>
    tpu.vector_store %arg7[%c0_41, %c0_42], %36 {strides = array<i32>} : memref<64x128xf32, #tpu.memory_space<vmem>>, vector<64x128xf32>,
    %c0_43 = arith.constant 0 : index
    %c360 = arith.constant 360 : index
    %c0_44 = arith.constant 0 : index
    %38 = vector.load %arg2[%c0_43, %c360, %c0_44] : memref<1x432x128xbf16, #tpu.memory_space<vmem>>, vector<1x64x128xbf16>
    %39 = vector.shape_cast %38 : vector<1x64x128xbf16> to vector<64x128xbf16>
    %c5 = arith.constant 5 : index
    %c0_45 = arith.constant 0 : index
    %c0_46 = arith.constant 0 : index
    %40 = vector.load %arg3[%c5, %c0_45, %c0_46] : memref<9x128x128xbf16, #tpu.memory_space<vmem>>, vector<1x128x128xbf16>
    %41 = vector.shape_cast %40 : vector<1x128x128xbf16> to vector<128x128xbf16>
    %cst_47 = arith.constant dense<0.000000e+00> : vector<64x128xf32>
    %42 = tpu.matmul %39, %41, %cst_47 {dimension_numbers = #tpu.dot_dimension_numbers<[1], [0], [0], [1], [0, 0, 1, 1], [], []>} : vector<64x128xbf16>, vector<128x128xbf16>, vector<64x128xf32> -> vector<64x128xf32>
    %c0_48 = arith.constant 0 : index
    %c0_49 = arith.constant 0 : index
    %43 = vector.load %arg7[%c0_48, %c0_49] : memref<64x128xf32, #tpu.memory_space<vmem>>, vector<64x128xf32>
    %44 = arith.addf %43, %42 : vector<64x128xf32>
    %c0_50 = arith.constant 0 : index
    %c0_51 = arith.constant 0 : index
    %45 = vector.load %arg7[%c0_50, %c0_51] : memref<64x128xf32, #tpu.memory_space<vmem>>, vector<64x128xf32>
    tpu.vector_store %arg7[%c0_50, %c0_51], %44 {strides = array<i32>} : memref<64x128xf32, #tpu.memory_space<vmem>>, vector<64x128xf32>,
    %c0_52 = arith.constant 0 : index
    %c8 = arith.constant 8 : index
    %c0_53 = arith.constant 0 : index
    %46 = vector.load %arg2[%c0_52, %c8, %c0_53] : memref<1x432x128xbf16, #tpu.memory_space<vmem>>, vector<1x64x128xbf16>
    %47 = vector.shape_cast %46 : vector<1x64x128xbf16> to vector<64x128xbf16>
    %c6 = arith.constant 6 : index
    %c0_54 = arith.constant 0 : index
    %c0_55 = arith.constant 0 : index
    %48 = vector.load %arg3[%c6, %c0_54, %c0_55] : memref<9x128x128xbf16, #tpu.memory_space<vmem>>, vector<1x128x128xbf16>
    %49 = vector.shape_cast %48 : vector<1x128x128xbf16> to vector<128x128xbf16>
    %cst_56 = arith.constant dense<0.000000e+00> : vector<64x128xf32>
    %50 = tpu.matmul %47, %49, %cst_56 {dimension_numbers = #tpu.dot_dimension_numbers<[1], [0], [0], [1], [0, 0, 1, 1], [], []>} : vector<64x128xbf16>, vector<128x128xbf16>, vector<64x128xf32> -> vector<64x128xf32>
    %c0_57 = arith.constant 0 : index
    %c0_58 = arith.constant 0 : index
    %51 = vector.load %arg7[%c0_57, %c0_58] : memref<64x128xf32, #tpu.memory_space<vmem>>, vector<64x128xf32>
    %52 = arith.addf %51, %50 : vector<64x128xf32>
    %c0_59 = arith.constant 0 : index
    %c0_60 = arith.constant 0 : index
    %53 = vector.load %arg7[%c0_59, %c0_60] : memref<64x128xf32, #tpu.memory_space<vmem>>, vector<64x128xf32>
    tpu.vector_store %arg7[%c0_59, %c0_60], %52 {strides = array<i32>} : memref<64x128xf32, #tpu.memory_space<vmem>>, vector<64x128xf32>,
    %c0_61 = arith.constant 0 : index
    %c152 = arith.constant 152 : index
    %c0_62 = arith.constant 0 : index
    %54 = vector.load %arg2[%c0_61, %c152, %c0_62] : memref<1x432x128xbf16, #tpu.memory_space<vmem>>, vector<1x64x128xbf16>
    %55 = vector.shape_cast %54 : vector<1x64x128xbf16> to vector<64x128xbf16>
    %c7 = arith.constant 7 : index
    %c0_63 = arith.constant 0 : index
    %c0_64 = arith.constant 0 : index
    %56 = vector.load %arg3[%c7, %c0_63, %c0_64] : memref<9x128x128xbf16, #tpu.memory_space<vmem>>, vector<1x128x128xbf16>
    %57 = vector.shape_cast %56 : vector<1x128x128xbf16> to vector<128x128xbf16>
    %cst_65 = arith.constant dense<0.000000e+00> : vector<64x128xf32>
    %58 = tpu.matmul %55, %57, %cst_65 {dimension_numbers = #tpu.dot_dimension_numbers<[1], [0], [0], [1], [0, 0, 1, 1], [], []>} : vector<64x128xbf16>, vector<128x128xbf16>, vector<64x128xf32> -> vector<64x128xf32>
    %c0_66 = arith.constant 0 : index
    %c0_67 = arith.constant 0 : index
    %59 = vector.load %arg7[%c0_66, %c0_67] : memref<64x128xf32, #tpu.memory_space<vmem>>, vector<64x128xf32>
    %60 = arith.addf %59, %58 : vector<64x128xf32>
    %c0_68 = arith.constant 0 : index
    %c0_69 = arith.constant 0 : index
    %61 = vector.load %arg7[%c0_68, %c0_69] : memref<64x128xf32, #tpu.memory_space<vmem>>, vector<64x128xf32>
    tpu.vector_store %arg7[%c0_68, %c0_69], %60 {strides = array<i32>} : memref<64x128xf32, #tpu.memory_space<vmem>>, vector<64x128xf32>,
    %c0_70 = arith.constant 0 : index
    %c296 = arith.constant 296 : index
    %c0_71 = arith.constant 0 : index
    %62 = vector.load %arg2[%c0_70, %c296, %c0_71] : memref<1x432x128xbf16, #tpu.memory_space<vmem>>, vector<1x64x128xbf16>
    %63 = vector.shape_cast %62 : vector<1x64x128xbf16> to vector<64x128xbf16>
    %c8_72 = arith.constant 8 : index
    %c0_73 = arith.constant 0 : index
    %c0_74 = arith.constant 0 : index
    %64 = vector.load %arg3[%c8_72, %c0_73, %c0_74] : memref<9x128x128xbf16, #tpu.memory_space<vmem>>, vector<1x128x128xbf16>
    %65 = vector.shape_cast %64 : vector<1x128x128xbf16> to vector<128x128xbf16>
    %cst_75 = arith.constant dense<0.000000e+00> : vector<64x128xf32>
    %66 = tpu.matmul %63, %65, %cst_75 {dimension_numbers = #tpu.dot_dimension_numbers<[1], [0], [0], [1], [0, 0, 1, 1], [], []>} : vector<64x128xbf16>, vector<128x128xbf16>, vector<64x128xf32> -> vector<64x128xf32>
    %c0_76 = arith.constant 0 : index
    %c0_77 = arith.constant 0 : index
    %67 = vector.load %arg7[%c0_76, %c0_77] : memref<64x128xf32, #tpu.memory_space<vmem>>, vector<64x128xf32>
    %68 = arith.addf %67, %66 : vector<64x128xf32>
    %c0_78 = arith.constant 0 : index
    %c0_79 = arith.constant 0 : index
    %69 = vector.load %arg7[%c0_78, %c0_79] : memref<64x128xf32, #tpu.memory_space<vmem>>, vector<64x128xf32>
    tpu.vector_store %arg7[%c0_78, %c0_79], %68 {strides = array<i32>} : memref<64x128xf32, #tpu.memory_space<vmem>>, vector<64x128xf32>,
    %c0_80 = arith.constant 0 : index
    %c0_81 = arith.constant 0 : index
    %70 = vector.load %arg7[%c0_80, %c0_81] : memref<64x128xf32, #tpu.memory_space<vmem>>, vector<64x128xf32>
    %71 = arith.truncf %70 : vector<64x128xf32> to vector<64x128xbf16>
    %c0_82 = arith.constant 0 : index
    %c0_83 = arith.constant 0 : index
    %c0_84 = arith.constant 0 : index
    %72 = vector.load %arg4[%c0_82, %c0_83, %c0_84] : memref<1x64x128xbf16, #tpu.memory_space<vmem>>, vector<1x64x128xbf16>
    %73 = vector.shape_cast %72 : vector<1x64x128xbf16> to vector<64x128xbf16>
    %74 = vector.shape_cast %71 : vector<64x128xbf16> to vector<1x64x128xbf16>
    tpu.vector_store %arg4[%c0_82, %c0_83, %c0_84], %74 {strides = array<i32>} : memref<1x64x128xbf16, #tpu.memory_space<vmem>>, vector<1x64x128xbf16>,
    %cst_85 = arith.constant dense<0.000000e+00> : vector<128xf32>
    %75 = vector.multi_reduction <add>, %70, %cst_85 [0] : vector<64x128xf32> to vector<128xf32>
    %76 = vector.shape_cast %75 : vector<128xf32> to vector<1x128xf32>
    %c0_86 = arith.constant 0 : index
    %c0_87 = arith.constant 0 : index
    %c0_88 = arith.constant 0 : index
    %77 = vector.load %arg5[%c0_86, %c0_87, %c0_88] : memref<1x1x128xf32, #tpu.memory_space<vmem>>, vector<1x1x128xf32>
    %78 = vector.shape_cast %77 : vector<1x1x128xf32> to vector<1x128xf32>
    %79 = vector.shape_cast %76 : vector<1x128xf32> to vector<1x1x128xf32>
    tpu.vector_store %arg5[%c0_86, %c0_87, %c0_88], %79 {strides = array<i32>} : memref<1x1x128xf32, #tpu.memory_space<vmem>>, vector<1x1x128xf32>,
    %80 = arith.mulf %70, %70 : vector<64x128xf32>
    %cst_89 = arith.constant dense<0.000000e+00> : vector<128xf32>
    %81 = vector.multi_reduction <add>, %80, %cst_89 [0] : vector<64x128xf32> to vector<128xf32>
    %82 = vector.shape_cast %81 : vector<128xf32> to vector<1x128xf32>
    %c0_90 = arith.constant 0 : index
    %c0_91 = arith.constant 0 : index
    %c0_92 = arith.constant 0 : index
    %83 = vector.load %arg6[%c0_90, %c0_91, %c0_92] : memref<1x1x128xf32, #tpu.memory_space<vmem>>, vector<1x1x128xf32>
    %84 = vector.shape_cast %83 : vector<1x1x128xf32> to vector<1x128xf32>
    %85 = vector.shape_cast %82 : vector<1x128xf32> to vector<1x1x128xf32>
    tpu.vector_store %arg6[%c0_90, %c0_91, %c0_92], %85 {strides = array<i32>} : memref<1x1x128xf32, #tpu.memory_space<vmem>>, vector<1x1x128xf32>,
    return
  }
  func.func @transform_0(%arg0: i32, %arg1: i32) -> (i32, i32, i32) {
    %c0_i32 = arith.constant 0 : i32
    %c0_i32_0 = arith.constant 0 : i32
    %c0_i32_1 = arith.constant 0 : i32
    return %arg0, %c0_i32, %c0_i32_0 : i32, i32, i32
  }
  func.func @transform_1(%arg0: i32, %arg1: i32) -> (i32, i32, i32) {
    %c0_i32 = arith.constant 0 : i32
    %c0_i32_0 = arith.constant 0 : i32
    %c0_i32_1 = arith.constant 0 : i32
    return %c0_i32, %c0_i32_0, %arg1 : i32, i32, i32
  }
  func.func @transform_2(%arg0: i32, %arg1: i32) -> (i32, i32, i32) {
    %c0_i32 = arith.constant 0 : i32
    %c0_i32_0 = arith.constant 0 : i32
    return %arg0, %c0_i32, %arg1 : i32, i32, i32
  }
  func.func @transform_3(%arg0: i32, %arg1: i32) -> (i32, i32, i32) {
    %c0_i32 = arith.constant 0 : i32
    %c0_i32_0 = arith.constant 0 : i32
    return %arg0, %c0_i32, %arg1 : i32, i32, i32
  }
  func.func @transform_4(%arg0: i32, %arg1: i32) -> (i32, i32, i32) {
    %c0_i32 = arith.constant 0 : i32
    %c0_i32_0 = arith.constant 0 : i32
    return %arg0, %c0_i32, %arg1 : i32, i32, i32
  }
}

module attributes {stable_mosaic.version = 11 : i64} {
  func.func @kernel(%arg0: i32, %arg1: i32, %arg2: memref<1x240x128xbf16, #tpu.memory_space<vmem>>, %arg3: memref<9x128x128xbf16, #tpu.memory_space<vmem>>, %arg4: memref<1x64x128xbf16, #tpu.memory_space<vmem>>, %arg5: memref<128x128xbf16, #tpu.memory_space<vmem>>, %arg6: memref<1x64x128xf32, #tpu.memory_space<vmem>>, %arg7: memref<64x128xf32, #tpu.memory_space<vmem>>) attributes {dimension_semantics = [#tpu.dimension_semantics<parallel>, #tpu.dimension_semantics<parallel>], iteration_bounds = array<i64: 2, 1>, scalar_prefetch = 0 : i64, scratch_operands = 1 : i64, tpu.core_type = #tpu.core_type<tc>, window_params = [{transform_indices = @transform_0, window_bounds = array<i64: 1, 240, 128>}, {transform_indices = @transform_1, window_bounds = array<i64: 9, 128, 128>}, {transform_indices = @transform_2, window_bounds = array<i64: 1, 64, 128>}, {transform_indices = @transform_3, window_bounds = array<i64: 128, 128>}, {transform_indices = @transform_4, window_bounds = array<i64: 1, 64, 128>}]} {
    %c0 = arith.constant 0 : index
    %c0_0 = arith.constant 0 : index
    %c0_1 = arith.constant 0 : index
    %0 = vector.load %arg2[%c0, %c0_0, %c0_1] : memref<1x240x128xbf16, #tpu.memory_space<vmem>>, vector<1x64x128xbf16>
    %1 = vector.shape_cast %0 : vector<1x64x128xbf16> to vector<64x128xbf16>
    %c0_2 = arith.constant 0 : index
    %c0_3 = arith.constant 0 : index
    %c0_4 = arith.constant 0 : index
    %2 = vector.load %arg3[%c0_2, %c0_3, %c0_4] : memref<9x128x128xbf16, #tpu.memory_space<vmem>>, vector<1x128x128xbf16>
    %3 = vector.shape_cast %2 : vector<1x128x128xbf16> to vector<128x128xbf16>
    %cst = arith.constant dense<0.000000e+00> : vector<64x128xf32>
    %4 = tpu.matmul %1, %3, %cst {dimension_numbers = #tpu.dot_dimension_numbers<[1], [0], [0], [1], [0, 0, 1, 1], [], []>} : vector<64x128xbf16>, vector<128x128xbf16>, vector<64x128xf32> -> vector<64x128xf32>
    %c0_5 = arith.constant 0 : index
    %c0_6 = arith.constant 0 : index
    %5 = vector.load %arg7[%c0_5, %c0_6] : memref<64x128xf32, #tpu.memory_space<vmem>>, vector<64x128xf32>
    tpu.vector_store %arg7[%c0_5, %c0_6], %4 {strides = array<i32>} : memref<64x128xf32, #tpu.memory_space<vmem>>, vector<64x128xf32>,
    %c0_7 = arith.constant 0 : index
    %c80 = arith.constant 80 : index
    %c0_8 = arith.constant 0 : index
    %6 = vector.load %arg2[%c0_7, %c80, %c0_8] : memref<1x240x128xbf16, #tpu.memory_space<vmem>>, vector<1x64x128xbf16>
    %7 = vector.shape_cast %6 : vector<1x64x128xbf16> to vector<64x128xbf16>
    %c1 = arith.constant 1 : index
    %c0_9 = arith.constant 0 : index
    %c0_10 = arith.constant 0 : index
    %8 = vector.load %arg3[%c1, %c0_9, %c0_10] : memref<9x128x128xbf16, #tpu.memory_space<vmem>>, vector<1x128x128xbf16>
    %9 = vector.shape_cast %8 : vector<1x128x128xbf16> to vector<128x128xbf16>
    %cst_11 = arith.constant dense<0.000000e+00> : vector<64x128xf32>
    %10 = tpu.matmul %7, %9, %cst_11 {dimension_numbers = #tpu.dot_dimension_numbers<[1], [0], [0], [1], [0, 0, 1, 1], [], []>} : vector<64x128xbf16>, vector<128x128xbf16>, vector<64x128xf32> -> vector<64x128xf32>
    %c0_12 = arith.constant 0 : index
    %c0_13 = arith.constant 0 : index
    %11 = vector.load %arg7[%c0_12, %c0_13] : memref<64x128xf32, #tpu.memory_space<vmem>>, vector<64x128xf32>
    %12 = arith.addf %11, %10 : vector<64x128xf32>
    %c0_14 = arith.constant 0 : index
    %c0_15 = arith.constant 0 : index
    %13 = vector.load %arg7[%c0_14, %c0_15] : memref<64x128xf32, #tpu.memory_space<vmem>>, vector<64x128xf32>
    tpu.vector_store %arg7[%c0_14, %c0_15], %12 {strides = array<i32>} : memref<64x128xf32, #tpu.memory_space<vmem>>, vector<64x128xf32>,
    %c0_16 = arith.constant 0 : index
    %c160 = arith.constant 160 : index
    %c0_17 = arith.constant 0 : index
    %14 = vector.load %arg2[%c0_16, %c160, %c0_17] : memref<1x240x128xbf16, #tpu.memory_space<vmem>>, vector<1x64x128xbf16>
    %15 = vector.shape_cast %14 : vector<1x64x128xbf16> to vector<64x128xbf16>
    %c2 = arith.constant 2 : index
    %c0_18 = arith.constant 0 : index
    %c0_19 = arith.constant 0 : index
    %16 = vector.load %arg3[%c2, %c0_18, %c0_19] : memref<9x128x128xbf16, #tpu.memory_space<vmem>>, vector<1x128x128xbf16>
    %17 = vector.shape_cast %16 : vector<1x128x128xbf16> to vector<128x128xbf16>
    %cst_20 = arith.constant dense<0.000000e+00> : vector<64x128xf32>
    %18 = tpu.matmul %15, %17, %cst_20 {dimension_numbers = #tpu.dot_dimension_numbers<[1], [0], [0], [1], [0, 0, 1, 1], [], []>} : vector<64x128xbf16>, vector<128x128xbf16>, vector<64x128xf32> -> vector<64x128xf32>
    %c0_21 = arith.constant 0 : index
    %c0_22 = arith.constant 0 : index
    %19 = vector.load %arg7[%c0_21, %c0_22] : memref<64x128xf32, #tpu.memory_space<vmem>>, vector<64x128xf32>
    %20 = arith.addf %19, %18 : vector<64x128xf32>
    %c0_23 = arith.constant 0 : index
    %c0_24 = arith.constant 0 : index
    %21 = vector.load %arg7[%c0_23, %c0_24] : memref<64x128xf32, #tpu.memory_space<vmem>>, vector<64x128xf32>
    tpu.vector_store %arg7[%c0_23, %c0_24], %20 {strides = array<i32>} : memref<64x128xf32, #tpu.memory_space<vmem>>, vector<64x128xf32>,
    %c0_25 = arith.constant 0 : index
    %c8 = arith.constant 8 : index
    %c0_26 = arith.constant 0 : index
    %22 = vector.load %arg2[%c0_25, %c8, %c0_26] : memref<1x240x128xbf16, #tpu.memory_space<vmem>>, vector<1x64x128xbf16>
    %23 = vector.shape_cast %22 : vector<1x64x128xbf16> to vector<64x128xbf16>
    %c3 = arith.constant 3 : index
    %c0_27 = arith.constant 0 : index
    %c0_28 = arith.constant 0 : index
    %24 = vector.load %arg3[%c3, %c0_27, %c0_28] : memref<9x128x128xbf16, #tpu.memory_space<vmem>>, vector<1x128x128xbf16>
    %25 = vector.shape_cast %24 : vector<1x128x128xbf16> to vector<128x128xbf16>
    %cst_29 = arith.constant dense<0.000000e+00> : vector<64x128xf32>
    %26 = tpu.matmul %23, %25, %cst_29 {dimension_numbers = #tpu.dot_dimension_numbers<[1], [0], [0], [1], [0, 0, 1, 1], [], []>} : vector<64x128xbf16>, vector<128x128xbf16>, vector<64x128xf32> -> vector<64x128xf32>
    %c0_30 = arith.constant 0 : index
    %c0_31 = arith.constant 0 : index
    %27 = vector.load %arg7[%c0_30, %c0_31] : memref<64x128xf32, #tpu.memory_space<vmem>>, vector<64x128xf32>
    %28 = arith.addf %27, %26 : vector<64x128xf32>
    %c0_32 = arith.constant 0 : index
    %c0_33 = arith.constant 0 : index
    %29 = vector.load %arg7[%c0_32, %c0_33] : memref<64x128xf32, #tpu.memory_space<vmem>>, vector<64x128xf32>
    tpu.vector_store %arg7[%c0_32, %c0_33], %28 {strides = array<i32>} : memref<64x128xf32, #tpu.memory_space<vmem>>, vector<64x128xf32>,
    %c0_34 = arith.constant 0 : index
    %c88 = arith.constant 88 : index
    %c0_35 = arith.constant 0 : index
    %30 = vector.load %arg2[%c0_34, %c88, %c0_35] : memref<1x240x128xbf16, #tpu.memory_space<vmem>>, vector<1x64x128xbf16>
    %31 = vector.shape_cast %30 : vector<1x64x128xbf16> to vector<64x128xbf16>
    %c4 = arith.constant 4 : index
    %c0_36 = arith.constant 0 : index
    %c0_37 = arith.constant 0 : index
    %32 = vector.load %arg3[%c4, %c0_36, %c0_37] : memref<9x128x128xbf16, #tpu.memory_space<vmem>>, vector<1x128x128xbf16>
    %33 = vector.shape_cast %32 : vector<1x128x128xbf16> to vector<128x128xbf16>
    %cst_38 = arith.constant dense<0.000000e+00> : vector<64x128xf32>
    %34 = tpu.matmul %31, %33, %cst_38 {dimension_numbers = #tpu.dot_dimension_numbers<[1], [0], [0], [1], [0, 0, 1, 1], [], []>} : vector<64x128xbf16>, vector<128x128xbf16>, vector<64x128xf32> -> vector<64x128xf32>
    %c0_39 = arith.constant 0 : index
    %c0_40 = arith.constant 0 : index
    %35 = vector.load %arg7[%c0_39, %c0_40] : memref<64x128xf32, #tpu.memory_space<vmem>>, vector<64x128xf32>
    %36 = arith.addf %35, %34 : vector<64x128xf32>
    %c0_41 = arith.constant 0 : index
    %c0_42 = arith.constant 0 : index
    %37 = vector.load %arg7[%c0_41, %c0_42] : memref<64x128xf32, #tpu.memory_space<vmem>>, vector<64x128xf32>
    tpu.vector_store %arg7[%c0_41, %c0_42], %36 {strides = array<i32>} : memref<64x128xf32, #tpu.memory_space<vmem>>, vector<64x128xf32>,
    %c0_43 = arith.constant 0 : index
    %c168 = arith.constant 168 : index
    %c0_44 = arith.constant 0 : index
    %38 = vector.load %arg2[%c0_43, %c168, %c0_44] : memref<1x240x128xbf16, #tpu.memory_space<vmem>>, vector<1x64x128xbf16>
    %39 = vector.shape_cast %38 : vector<1x64x128xbf16> to vector<64x128xbf16>
    %c5 = arith.constant 5 : index
    %c0_45 = arith.constant 0 : index
    %c0_46 = arith.constant 0 : index
    %40 = vector.load %arg3[%c5, %c0_45, %c0_46] : memref<9x128x128xbf16, #tpu.memory_space<vmem>>, vector<1x128x128xbf16>
    %41 = vector.shape_cast %40 : vector<1x128x128xbf16> to vector<128x128xbf16>
    %cst_47 = arith.constant dense<0.000000e+00> : vector<64x128xf32>
    %42 = tpu.matmul %39, %41, %cst_47 {dimension_numbers = #tpu.dot_dimension_numbers<[1], [0], [0], [1], [0, 0, 1, 1], [], []>} : vector<64x128xbf16>, vector<128x128xbf16>, vector<64x128xf32> -> vector<64x128xf32>
    %c0_48 = arith.constant 0 : index
    %c0_49 = arith.constant 0 : index
    %43 = vector.load %arg7[%c0_48, %c0_49] : memref<64x128xf32, #tpu.memory_space<vmem>>, vector<64x128xf32>
    %44 = arith.addf %43, %42 : vector<64x128xf32>
    %c0_50 = arith.constant 0 : index
    %c0_51 = arith.constant 0 : index
    %45 = vector.load %arg7[%c0_50, %c0_51] : memref<64x128xf32, #tpu.memory_space<vmem>>, vector<64x128xf32>
    tpu.vector_store %arg7[%c0_50, %c0_51], %44 {strides = array<i32>} : memref<64x128xf32, #tpu.memory_space<vmem>>, vector<64x128xf32>,
    %c0_52 = arith.constant 0 : index
    %c16 = arith.constant 16 : index
    %c0_53 = arith.constant 0 : index
    %46 = vector.load %arg2[%c0_52, %c16, %c0_53] : memref<1x240x128xbf16, #tpu.memory_space<vmem>>, vector<1x64x128xbf16>
    %47 = vector.shape_cast %46 : vector<1x64x128xbf16> to vector<64x128xbf16>
    %c6 = arith.constant 6 : index
    %c0_54 = arith.constant 0 : index
    %c0_55 = arith.constant 0 : index
    %48 = vector.load %arg3[%c6, %c0_54, %c0_55] : memref<9x128x128xbf16, #tpu.memory_space<vmem>>, vector<1x128x128xbf16>
    %49 = vector.shape_cast %48 : vector<1x128x128xbf16> to vector<128x128xbf16>
    %cst_56 = arith.constant dense<0.000000e+00> : vector<64x128xf32>
    %50 = tpu.matmul %47, %49, %cst_56 {dimension_numbers = #tpu.dot_dimension_numbers<[1], [0], [0], [1], [0, 0, 1, 1], [], []>} : vector<64x128xbf16>, vector<128x128xbf16>, vector<64x128xf32> -> vector<64x128xf32>
    %c0_57 = arith.constant 0 : index
    %c0_58 = arith.constant 0 : index
    %51 = vector.load %arg7[%c0_57, %c0_58] : memref<64x128xf32, #tpu.memory_space<vmem>>, vector<64x128xf32>
    %52 = arith.addf %51, %50 : vector<64x128xf32>
    %c0_59 = arith.constant 0 : index
    %c0_60 = arith.constant 0 : index
    %53 = vector.load %arg7[%c0_59, %c0_60] : memref<64x128xf32, #tpu.memory_space<vmem>>, vector<64x128xf32>
    tpu.vector_store %arg7[%c0_59, %c0_60], %52 {strides = array<i32>} : memref<64x128xf32, #tpu.memory_space<vmem>>, vector<64x128xf32>,
    %c0_61 = arith.constant 0 : index
    %c96 = arith.constant 96 : index
    %c0_62 = arith.constant 0 : index
    %54 = vector.load %arg2[%c0_61, %c96, %c0_62] : memref<1x240x128xbf16, #tpu.memory_space<vmem>>, vector<1x64x128xbf16>
    %55 = vector.shape_cast %54 : vector<1x64x128xbf16> to vector<64x128xbf16>
    %c7 = arith.constant 7 : index
    %c0_63 = arith.constant 0 : index
    %c0_64 = arith.constant 0 : index
    %56 = vector.load %arg3[%c7, %c0_63, %c0_64] : memref<9x128x128xbf16, #tpu.memory_space<vmem>>, vector<1x128x128xbf16>
    %57 = vector.shape_cast %56 : vector<1x128x128xbf16> to vector<128x128xbf16>
    %cst_65 = arith.constant dense<0.000000e+00> : vector<64x128xf32>
    %58 = tpu.matmul %55, %57, %cst_65 {dimension_numbers = #tpu.dot_dimension_numbers<[1], [0], [0], [1], [0, 0, 1, 1], [], []>} : vector<64x128xbf16>, vector<128x128xbf16>, vector<64x128xf32> -> vector<64x128xf32>
    %c0_66 = arith.constant 0 : index
    %c0_67 = arith.constant 0 : index
    %59 = vector.load %arg7[%c0_66, %c0_67] : memref<64x128xf32, #tpu.memory_space<vmem>>, vector<64x128xf32>
    %60 = arith.addf %59, %58 : vector<64x128xf32>
    %c0_68 = arith.constant 0 : index
    %c0_69 = arith.constant 0 : index
    %61 = vector.load %arg7[%c0_68, %c0_69] : memref<64x128xf32, #tpu.memory_space<vmem>>, vector<64x128xf32>
    tpu.vector_store %arg7[%c0_68, %c0_69], %60 {strides = array<i32>} : memref<64x128xf32, #tpu.memory_space<vmem>>, vector<64x128xf32>,
    %c0_70 = arith.constant 0 : index
    %c176 = arith.constant 176 : index
    %c0_71 = arith.constant 0 : index
    %62 = vector.load %arg2[%c0_70, %c176, %c0_71] : memref<1x240x128xbf16, #tpu.memory_space<vmem>>, vector<1x64x128xbf16>
    %63 = vector.shape_cast %62 : vector<1x64x128xbf16> to vector<64x128xbf16>
    %c8_72 = arith.constant 8 : index
    %c0_73 = arith.constant 0 : index
    %c0_74 = arith.constant 0 : index
    %64 = vector.load %arg3[%c8_72, %c0_73, %c0_74] : memref<9x128x128xbf16, #tpu.memory_space<vmem>>, vector<1x128x128xbf16>
    %65 = vector.shape_cast %64 : vector<1x128x128xbf16> to vector<128x128xbf16>
    %cst_75 = arith.constant dense<0.000000e+00> : vector<64x128xf32>
    %66 = tpu.matmul %63, %65, %cst_75 {dimension_numbers = #tpu.dot_dimension_numbers<[1], [0], [0], [1], [0, 0, 1, 1], [], []>} : vector<64x128xbf16>, vector<128x128xbf16>, vector<64x128xf32> -> vector<64x128xf32>
    %c0_76 = arith.constant 0 : index
    %c0_77 = arith.constant 0 : index
    %67 = vector.load %arg7[%c0_76, %c0_77] : memref<64x128xf32, #tpu.memory_space<vmem>>, vector<64x128xf32>
    %68 = arith.addf %67, %66 : vector<64x128xf32>
    %c0_78 = arith.constant 0 : index
    %c0_79 = arith.constant 0 : index
    %69 = vector.load %arg7[%c0_78, %c0_79] : memref<64x128xf32, #tpu.memory_space<vmem>>, vector<64x128xf32>
    tpu.vector_store %arg7[%c0_78, %c0_79], %68 {strides = array<i32>} : memref<64x128xf32, #tpu.memory_space<vmem>>, vector<64x128xf32>,
    %c0_80 = arith.constant 0 : index
    %c0_81 = arith.constant 0 : index
    %70 = vector.load %arg7[%c0_80, %c0_81] : memref<64x128xf32, #tpu.memory_space<vmem>>, vector<64x128xf32>
    %c0_82 = arith.constant 0 : index
    %c0_83 = arith.constant 0 : index
    %c0_84 = arith.constant 0 : index
    %71 = vector.load %arg4[%c0_82, %c0_83, %c0_84] : memref<1x64x128xbf16, #tpu.memory_space<vmem>>, vector<1x64x128xbf16>
    %72 = vector.shape_cast %71 : vector<1x64x128xbf16> to vector<64x128xbf16>
    %c0_85 = arith.constant 0 : index
    %c0_86 = arith.constant 0 : index
    %73 = vector.load %arg5[%c0_85, %c0_86] : memref<128x128xbf16, #tpu.memory_space<vmem>>, vector<128x128xbf16>
    %cst_87 = arith.constant dense<0.000000e+00> : vector<64x128xf32>
    %74 = tpu.matmul %72, %73, %cst_87 {dimension_numbers = #tpu.dot_dimension_numbers<[1], [0], [0], [1], [0, 0, 1, 1], [], []>} : vector<64x128xbf16>, vector<128x128xbf16>, vector<64x128xf32> -> vector<64x128xf32>
    %75 = arith.addf %70, %74 : vector<64x128xf32>
    %c0_88 = arith.constant 0 : index
    %c0_89 = arith.constant 0 : index
    %76 = vector.load %arg7[%c0_88, %c0_89] : memref<64x128xf32, #tpu.memory_space<vmem>>, vector<64x128xf32>
    tpu.vector_store %arg7[%c0_88, %c0_89], %75 {strides = array<i32>} : memref<64x128xf32, #tpu.memory_space<vmem>>, vector<64x128xf32>,
    %c0_90 = arith.constant 0 : index
    %c0_91 = arith.constant 0 : index
    %77 = vector.load %arg7[%c0_90, %c0_91] : memref<64x128xf32, #tpu.memory_space<vmem>>, vector<64x128xf32>
    %c0_92 = arith.constant 0 : index
    %c0_93 = arith.constant 0 : index
    %c0_94 = arith.constant 0 : index
    %78 = vector.load %arg6[%c0_92, %c0_93, %c0_94] : memref<1x64x128xf32, #tpu.memory_space<vmem>>, vector<1x64x128xf32>
    %79 = vector.shape_cast %78 : vector<1x64x128xf32> to vector<64x128xf32>
    %80 = vector.shape_cast %77 : vector<64x128xf32> to vector<1x64x128xf32>
    tpu.vector_store %arg6[%c0_92, %c0_93, %c0_94], %80 {strides = array<i32>} : memref<1x64x128xf32, #tpu.memory_space<vmem>>, vector<1x64x128xf32>,
    return
  }
  func.func @transform_0(%arg0: i32, %arg1: i32) -> (i32, i32, i32) {
    %c0_i32 = arith.constant 0 : i32
    %c0_i32_0 = arith.constant 0 : i32
    %c0_i32_1 = arith.constant 0 : i32
    return %arg0, %c0_i32, %c0_i32_0 : i32, i32, i32
  }
  func.func @transform_1(%arg0: i32, %arg1: i32) -> (i32, i32, i32) {
    %c0_i32 = arith.constant 0 : i32
    %c0_i32_0 = arith.constant 0 : i32
    %c0_i32_1 = arith.constant 0 : i32
    return %c0_i32, %c0_i32_0, %arg1 : i32, i32, i32
  }
  func.func @transform_2(%arg0: i32, %arg1: i32) -> (i32, i32, i32) {
    %c0_i32 = arith.constant 0 : i32
    %c0_i32_0 = arith.constant 0 : i32
    %c0_i32_1 = arith.constant 0 : i32
    return %arg0, %c0_i32, %c0_i32_0 : i32, i32, i32
  }
  func.func @transform_3(%arg0: i32, %arg1: i32) -> (i32, i32) {
    %c0_i32 = arith.constant 0 : i32
    %c0_i32_0 = arith.constant 0 : i32
    return %c0_i32, %arg1 : i32, i32
  }
  func.func @transform_4(%arg0: i32, %arg1: i32) -> (i32, i32, i32) {
    %c0_i32 = arith.constant 0 : i32
    %c0_i32_0 = arith.constant 0 : i32
    return %arg0, %c0_i32, %arg1 : i32, i32, i32
  }
}

</mosaic_0001>

<bundles_post_ra>
// kernel: basic_block_forward.2
= control target key start
LH: loop header
LB: loop body
LE: loop exit
PB: predicated region body
PF: predicated region fallthrough
CT: control target
= control target key end

     0   :  { %s2617_s15 = smov 0   ;;  %s2619_s16 = smov 0   ;;  %s2962_s0 = inlined_call_operand.vmem [shape: bf16[2,432,128], index: 0, kind: input, shape index: {}]   ;;  %s2963_s1 = inlined_call_operand.vmem [shape: bf16[9,128,128], index: 1, kind: input, shape index: {}]   ;;  %s2964_s2 = inlined_call_operand.vmem [shape: bf16[2,64,128], index: 2, kind: output, shape index: {0}]   ;;  %s2965_s3 = inlined_call_operand.vmem [shape: f32[2,1,128], index: 3, kind: output, shape index: {1}]   ;;  %s2966_s4 = inlined_call_operand.vmem [shape: f32[2,1,128], index: 4, kind: output, shape index: {2}]  }
   0x1   :  { %s2621_s17 = smov 0  }
   0x2 LB: > { %s27_s18 = sadd.s32 1, %s2586_s16  ;;  %p1829_p0 = scmp.ge.s32.totalorder %s2590_s17, 1  ;;  %s2590_s17 = sphi %s2621_s17, %s15_s17   ;;  %s2586_s16 = sphi %s2619_s16, %s2968_s16   ;;  %s2582_s15 = sphi %s2617_s15, %s2967_s15  }
   0x3   : > { %p29_p1 = scmp.ge.s32.totalorder %s27_s18, 2  ;;  %p194_p2 = scmp.lt.s32.totalorder %s2590_s17, 3 }
   0x5   : > { %s2970_s18 = smov (%p29_p1, %s27_s18), 0  ;;  %p195_p3 = pnand %p1829_p0, %p194_p2 }
   0x6   : > { %p239_p4 = scmp.lt.s32.totalorder (!%p195_p3), %s2582_s15, 1 }
   0x7   : > { %198 = sbr.rel (%p195_p3) target bundleno = 347 (0x15b), region = 28 }
   0xc   : > { %v2407_v0 = vld [vmem:[%s2963_s1 + $0x38] sm:$0xff]  ;;  %v2406_v2 = vld [vmem:[%s2963_s1 + $0x30] sm:$0xff]  ;;  %v2405_v6 = vld [vmem:[%s2963_s1 + $0x28] sm:$0xff]  ;;  %s2972_s15 = smov (!%p239_p4, %s2582_s15), 1 }
   0xd   : > { %v2431_v1 = vld [vmem:[%s2963_s1 + $0xb8] sm:$0xff]  ;;  %2527 = vmatpush.bf16.msra.mxu1 %v2407_v0  ;;  %364 = vmatpush.bf16.msra.mxu0 %v2407_v0  ;;  %v2430_v3 = vld [vmem:[%s2963_s1 + $0xb0] sm:$0xff]  ;;  %v2429_v7 = vld [vmem:[%s2963_s1 + $0xa8] sm:$0xff]  ;;  %s2543_s9 = smul.u32 216, %s2972_s15  ;;  %s261_s23 = scalar_lea.vmem %s2965_s3, %s2972_s15 }
   0xe   : > { %648 = vmatpush.bf16.msra.mxu2 %v2431_v1  ;;  %v2443_v4 = vld [vmem:[%s2963_s1 + $0xf8] sm:$0xff]  ;;  %v2442_v5 = vld [vmem:[%s2963_s1 + $0xf0] sm:$0xff]  ;;  %v2441_v8 = vld [vmem:[%s2963_s1 + $0xe8] sm:$0xff]  ;;  %s267_s26 = scalar_lea.vmem %s2966_s4, %s2972_s15 }
   0xf   : > { %798 = vmatpush.bf16.msra.mxu3 %v2443_v4  ;;  %v2404_v9 = vld [vmem:[%s2963_s1 + $0x20] sm:$0xff]  ;;  %v2403_v12 = vld [vmem:[%s2963_s1 + $0x18] sm:$0xff]  ;;  %v2402_v15 = vld [vmem:[%s2963_s1 + $0x10] sm:$0xff]  ;;  %s2711_s22 = scalar_lea.vmem %s2962_s0, %s2543_s9 }
  0x10   : > { %v2428_v10 = vld [vmem:[%s2963_s1 + $0xa0] sm:$0xff]  ;;  %v2427_v13 = vld [vmem:[%s2963_s1 + $0x98] sm:$0xff]  ;;  %v2426_v16 = vld [vmem:[%s2963_s1 + $0x90] sm:$0xff] }
  0x11   : > { %2528 = vmatpush.bf16.msra.mxu1 %v2406_v2  ;;  %365 = vmatpush.bf16.msra.mxu0 %v2406_v2  ;;  %v2440_v11 = vld [vmem:[%s2963_s1 + $0xe0] sm:$0xff]  ;;  %v2439_v14 = vld [vmem:[%s2963_s1 + $0xd8] sm:$0xff]  ;;  %v2438_v17 = vld [vmem:[%s2963_s1 + $0xd0] sm:$0xff] }
  0x12   : > { %649 = vmatpush.bf16.msra.mxu2 %v2430_v3  ;;  %v2401_v18 = vld [vmem:[%s2963_s1 + $0x8] sm:$0xff]  ;;  %v2400_v21 = vld [vmem:[%s2963_s1] sm:$0xff]  ;;  %v2419_v22 = vld [vmem:[%s2963_s1 + $0x78] sm:$0xff] }
  0x13   : > { %799 = vmatpush.bf16.msra.mxu3 %v2442_v5  ;;  %v2425_v19 = vld [vmem:[%s2963_s1 + $0x88] sm:$0xff]  ;;  %v2424_v23 = vld [vmem:[%s2963_s1 + $0x80] sm:$0xff]  ;;  %v2455_v24 = vld [vmem:[%s2963_s1 + $0x138] sm:$0xff] }
  0x14   : > { %v2437_v20 = vld [vmem:[%s2963_s1 + $0xc8] sm:$0xff]  ;;  %v2479_v25 = vld [vmem:[%s2963_s1 + $0x1b8] sm:$0xff]  ;;  %v2398_v26 = vld [vmem:[%s2711_s22 + $0x10] sm:$0xff] }
  0x15   : > { %2529 = vmatpush.bf16.msra.mxu1 %v2405_v6  ;;  %366 = vmatpush.bf16.msra.mxu0 %v2405_v6  ;;  %v2396_v27 = vld [vmem:[%s2711_s22] sm:$0xff]  ;;  %v2420_v28 = vld [vmem:[%s2711_s22 + $0x90] sm:$0xff]  ;;  %v2491_v31 = vld [vmem:[%s2963_s1 + $0x1f8] sm:$0xff] }
  0x16   : > { %650 = vmatpush.bf16.msra.mxu2 %v2429_v7  ;;  %v2436_v29 = vld [vmem:[%s2963_s1 + $0xc0] sm:$0xff]  ;;  %v2418_v30 = vld [vmem:[%s2963_s1 + $0x70] sm:$0xff]  ;;  %v2417_v35 = vld [vmem:[%s2963_s1 + $0x68] sm:$0xff] }
  0x17   : > { %800 = vmatpush.bf16.msra.mxu3 %v2441_v8  ;;  %v2454_v32 = vld [vmem:[%s2963_s1 + $0x130] sm:$0xff]  ;;  %v2432_v34 = vld [vmem:[%s2711_s22 + $0x24] sm:$0xff]  ;;  %v2415_v43 = vld [vmem:[%s2963_s1 + $0x58] sm:$0xff] }
  0x18   : > { %v2478_v33 = vld [vmem:[%s2963_s1 + $0x1b0] sm:$0xff]  ;;  %v2453_v37 = vld [vmem:[%s2963_s1 + $0x128] sm:$0xff]  ;;  %v2416_v39 = vld [vmem:[%s2963_s1 + $0x60] sm:$0xff] }
  0x19   : > { %2530 = vmatpush.bf16.msra.mxu1 %v2404_v9  ;;  %367 = vmatpush.bf16.msra.mxu0 %v2404_v9  ;;  %v2490_v36 = vld [vmem:[%s2963_s1 + $0x1f0] sm:$0xff]  ;;  %v2477_v38 = vld [vmem:[%s2963_s1 + $0x1a8] sm:$0xff]  ;;  %v2452_v41 = vld [vmem:[%s2963_s1 + $0x120] sm:$0xff] }
  0x1a   : > { %651 = vmatpush.bf16.msra.mxu2 %v2428_v10  ;;  %v2489_v40 = vld [vmem:[%s2963_s1 + $0x1e8] sm:$0xff]  ;;  %v2476_v42 = vld [vmem:[%s2963_s1 + $0x1a0] sm:$0xff]  ;;  %v2451_v44 = vld [vmem:[%s2963_s1 + $0x118] sm:$0xff] }
  0x1b   : > { %801 = vmatpush.bf16.msra.mxu3 %v2440_v11  ;;  %v2399_v45 = vld [vmem:[%s2711_s22 + $0x18] sm:$0xff]  ;;  %v2397_v46 = vld [vmem:[%s2711_s22 + $0x8] sm:$0xff]  ;;  %v2414_v48 = vld [vmem:[%s2963_s1 + $0x50] sm:$0xff] }
  0x1c   : > { %v2421_v47 = vld [vmem:[%s2711_s22 + $0x98] sm:$0xff]  ;;  %v2450_v49 = vld [vmem:[%s2963_s1 + $0x110] sm:$0xff]  ;;  %v2488_v52 = vld [vmem:[%s2963_s1 + $0x1e0] sm:$0xff] }
  0x1d   : > { %2531 = vmatpush.bf16.msra.mxu1 %v2403_v12  ;;  %368 = vmatpush.bf16.msra.mxu0 %v2403_v12  ;;  %v2433_v50 = vld [vmem:[%s2711_s22 + $0x2c] sm:$0xff]  ;;  %v2475_v51 = vld [vmem:[%s2963_s1 + $0x198] sm:$0xff]  ;;  %v2412_v57 = vld [vmem:[%s2963_s1 + $0x40] sm:$0xff] }
  0x1e   : > { %652 = vmatpush.bf16.msra.mxu2 %v2427_v13  ;;  %v2413_v53 = vld [vmem:[%s2963_s1 + $0x48] sm:$0xff]  ;;  %v2474_v54 = vld [vmem:[%s2963_s1 + $0x190] sm:$0xff]  ;;  %v2487_v56 = vld [vmem:[%s2963_s1 + $0x1d8] sm:$0xff] }
  0x1f   : > { %802 = vmatpush.bf16.msra.mxu3 %v2439_v14  ;;  %v2449_v55 = vld [vmem:[%s2963_s1 + $0x108] sm:$0xff]  ;;  %v2467_v58 = vld [vmem:[%s2963_s1 + $0x178] sm:$0xff]  ;;  %v2448_v59 = vld [vmem:[%s2963_s1 + $0x100] sm:$0xff] }
  0x20   : > { %v2503_v60 = vld [vmem:[%s2963_s1 + $0x238] sm:$0xff]  ;;  %v2466_v61 = vld [vmem:[%s2963_s1 + $0x170] sm:$0xff]  ;;  %v2408_v62 = vld [vmem:[%s2711_s22 + $0x48] sm:$0xff] }
  0x21   : > { %2532 = vmatpush.bf16.msra.mxu1 %v2402_v15  ;;  %369 = vmatpush.bf16.msra.mxu0 %v2402_v15  ;;  %v2444_v63 = vld [vmem:[%s2711_s22 + $0x6c] sm:$0xff]  ;;  %v2422_v0 = vld [vmem:[%s2711_s22 + $0xa0] sm:$0xff]  ;;  %v2434_v4 = vld [vmem:[%s2711_s22 + $0x34] sm:$0xff] }
  0x22   : > { %653 = vmatpush.bf16.msra.mxu2 %v2426_v16  ;;  %v2502_v1 = vld [vmem:[%s2963_s1 + $0x230] sm:$0xff]  ;;  %v2465_v2 = vld [vmem:[%s2963_s1 + $0x168] sm:$0xff]  ;;  %v2472_v7 = vld [vmem:[%s2963_s1 + $0x180] sm:$0xff] }
  0x23   : > { %803 = vmatpush.bf16.msra.mxu3 %v2438_v17  ;;  %v2473_v3 = vld [vmem:[%s2963_s1 + $0x188] sm:$0xff]  ;;  %v2486_v6 = vld [vmem:[%s2963_s1 + $0x1d0] sm:$0xff]  ;;  %v2464_v8 = vld [vmem:[%s2963_s1 + $0x160] sm:$0xff] }
  0x24   : > { %v2501_v5 = vld [vmem:[%s2963_s1 + $0x228] sm:$0xff]  ;;  %v2500_v10 = vld [vmem:[%s2963_s1 + $0x220] sm:$0xff]  ;;  %v2463_v11 = vld [vmem:[%s2963_s1 + $0x158] sm:$0xff] }
  0x25   : > { %2533 = vmatpush.bf16.msra.mxu1 %v2401_v18  ;;  %370 = vmatpush.bf16.msra.mxu0 %v2401_v18  ;;  %v2485_v9 = vld [vmem:[%s2963_s1 + $0x1c8] sm:$0xff]  ;;  %v2462_v12 = vld [vmem:[%s2963_s1 + $0x150] sm:$0xff]  ;;  %v2435_v16 = vld [vmem:[%s2711_s22 + $0x3c] sm:$0xff] }
  0x26   : > { %654 = vmatpush.bf16.msra.mxu2 %v2425_v19  ;;  %v2409_v13 = vld [vmem:[%s2711_s22 + $0x50] sm:$0xff]  ;;  %v2423_v15 = vld [vmem:[%s2711_s22 + $0xa8] sm:$0xff]  ;;  %v2499_v18 = vld [vmem:[%s2963_s1 + $0x218] sm:$0xff] }
  0x27   : > { %804 = vmatpush.bf16.msra.mxu3 %v2437_v20  ;;  %v2445_v14 = vld [vmem:[%s2711_s22 + $0x74] sm:$0xff]  ;;  %v2461_v17 = vld [vmem:[%s2963_s1 + $0x148] sm:$0xff]  ;;  %v2484_v19 = vld [vmem:[%s2963_s1 + $0x1c0] sm:$0xff] }
  0x28   : > { %v2498_v20 = vld [vmem:[%s2963_s1 + $0x210] sm:$0xff] }
  0x29   : > { %2534 = vmatpush.bf16.msra.mxu1 %v2400_v21  ;;  %371 = vmatpush.bf16.msra.mxu0 %v2400_v21  ;;  %v2460_v21 = vld [vmem:[%s2963_s1 + $0x140] sm:$0xff] }
  0x2a   : > { %655 = vmatpush.bf16.msra.mxu2 %v2424_v23  ;;  %v2410_v23 = vld [vmem:[%s2711_s22 + $0x58] sm:$0xff] }
  0x2b   : > { %805 = vmatpush.bf16.msra.mxu3 %v2436_v29  ;;  %v2447_v29 = vld [vmem:[%s2711_s22 + $0x84] sm:$0xff] }
  0x2c   : > { %382 = vmatmul.bf16.vlgmr.msra.gmra.mxu1 %v2398_v26  ;;  %372 = vmatmul.bf16.vlgmr.msra.gmra.mxu0 %v2396_v27  ;;  %v2480_v26 = vld [vmem:[%s2711_s22 + $0x4c] sm:$0xff]  ;;  %v2496_v27 = vld [vmem:[%s2963_s1 + $0x200] sm:$0xff] }
  0x2d   : > { %498 = vmatpush.bf16.msrb.mxu1 %v2419_v22  ;;  %948 = vmatpush.bf16.msrb.mxu0 %v2455_v24  ;;  %v2497_v22 = vld [vmem:[%s2963_s1 + $0x208] sm:$0xff]  ;;  %v2446_v24 = vld [vmem:[%s2711_s22 + $0x7c] sm:$0xff] }
  0x2e   : > { %1248 = vmatpush.bf16.msrb.mxu2 %v2479_v25  ;;  %806 = vmatmul.bf16.vlgmr.msra.gmra.mxu3 %v2432_v34  ;;  %v2468_v25 = vld [vmem:[%s2711_s22 + $0x4] sm:$0xff]  ;;  %v2470_v34 = vld [vmem:[%s2711_s22 + $0x14] sm:$0xff] }
  0x2f   : > { %656 = vmatmul.bf16.vlgmr.msra.gmra.mxu2 %v2420_v28  ;;  %1398 = vmatpush.bf16.msrb.mxu3 %v2491_v31  ;;  %v2411_v28 = vld [vmem:[%s2711_s22 + $0x60] sm:$0xff]  ;;  %v2481_v31 = vld [vmem:[%s2711_s22 + $0x54] sm:$0xff] }
  0x31   : > { %499 = vmatpush.bf16.msrb.mxu1 %v2418_v30  ;;  %949 = vmatpush.bf16.msrb.mxu0 %v2454_v32  ;;  %v2469_v30 = vld [vmem:[%s2711_s22 + $0xc] sm:$0xff]  ;;  %v2456_v32 = vld [vmem:[%s2711_s22 + $0xb4] sm:$0xff] }
  0x32   : > { %1249 = vmatpush.bf16.msrb.mxu2 %v2478_v33  ;;  %v2492_v33 = vld [vmem:[%s2711_s22 + $0x94] sm:$0xff] }
  0x33   : > { %1399 = vmatpush.bf16.msrb.mxu3 %v2490_v36  ;;  %v2457_v36 = vld [vmem:[%s2711_s22 + $0xbc] sm:$0xff] }
  0x35   : > { %500 = vmatpush.bf16.msrb.mxu1 %v2417_v35  ;;  %950 = vmatpush.bf16.msrb.mxu0 %v2453_v37  ;;  %v2482_v35 = vld [vmem:[%s2711_s22 + $0x5c] sm:$0xff] }
  0x36   : > { %1250 = vmatpush.bf16.msrb.mxu2 %v2477_v38  ;;  %v2493_v37 = vld [vmem:[%s2711_s22 + $0x9c] sm:$0xff] }
  0x37   : > { %1400 = vmatpush.bf16.msrb.mxu3 %v2489_v40  ;;  %v2471_v38 = vld [vmem:[%s2711_s22 + $0x1c] sm:$0xff]  ;;  %v2458_v40 = vld [vmem:[%s2711_s22 + $0xc4] sm:$0xff] }
  0x39   : > { %501 = vmatpush.bf16.msrb.mxu1 %v2416_v39  ;;  %951 = vmatpush.bf16.msrb.mxu0 %v2452_v41  ;;  %v2483_v39 = vld [vmem:[%s2711_s22 + $0x64] sm:$0xff] }
  0x3a   : > { %1251 = vmatpush.bf16.msrb.mxu2 %v2476_v42  ;;  %v2494_v41 = vld [vmem:[%s2711_s22 + $0xa4] sm:$0xff] }
  0x3b   : > { %1401 = vmatpush.bf16.msrb.mxu3 %v2488_v52 }
  0x3c   : > { %387 = vmatmul.bf16.gmra.mxu1 %v2399_v45  ;;  %377 = vmatmul.bf16.gmra.mxu0 %v2397_v46 }
  0x3d   : > { %502 = vmatpush.bf16.msrb.mxu1 %v2415_v43  ;;  %952 = vmatpush.bf16.msrb.mxu0 %v2451_v44  ;;  %v2495_v44 = vld [vmem:[%s2711_s22 + $0xac] sm:$0xff] }
  0x3e   : > { %1252 = vmatpush.bf16.msrb.mxu2 %v2475_v51  ;;  %811 = vmatmul.bf16.gmra.mxu3 %v2433_v50 }
  0x3f   : > { %661 = vmatmul.bf16.gmra.mxu2 %v2421_v47  ;;  %1402 = vmatpush.bf16.msrb.mxu3 %v2487_v56 }
  0x41   : > { %503 = vmatpush.bf16.msrb.mxu1 %v2414_v48  ;;  %953 = vmatpush.bf16.msrb.mxu0 %v2450_v49  ;;  %v2459_v49 = vld [vmem:[%s2711_s22 + $0xcc] sm:$0xff]  ;;  %s2395_s22 = sshll.u32 %s2972_s15, 5 }
  0x42   : > { %1253 = vmatpush.bf16.msrb.mxu2 %v2474_v54  ;;  %s2928_s19 = scalar_lea.vmem %s2964_s2, %s2395_s22 }
  0x43   : > { %1403 = vmatpush.bf16.msrb.mxu3 %v2486_v6 }
  0x45   : > { %504 = vmatpush.bf16.msrb.mxu1 %v2413_v53  ;;  %954 = vmatpush.bf16.msrb.mxu0 %v2449_v55 }
  0x46   : > { %1254 = vmatpush.bf16.msrb.mxu2 %v2473_v3 }
  0x47   : > { %1404 = vmatpush.bf16.msrb.mxu3 %v2485_v9 }
  0x49   : > { %505 = vmatpush.bf16.msrb.mxu1 %v2412_v57  ;;  %955 = vmatpush.bf16.msrb.mxu0 %v2448_v59 }
  0x4a   : > { %1255 = vmatpush.bf16.msrb.mxu2 %v2472_v7 }
  0x4b   : > { %1405 = vmatpush.bf16.msrb.mxu3 %v2484_v19 }
  0x4c   : > { %506 = vmatmul.bf16.vlgmr.msrb.gmra.mxu1 %v2408_v62  ;;  %956 = vmatmul.bf16.vlgmr.msrb.gmra.mxu0 %v2444_v63 }
  0x4d   : > { %1098 = vmatpush.bf16.msra.mxu1 %v2467_v58  ;;  %1548 = vmatpush.bf16.msra.mxu0 %v2503_v60 }
  0x4e   : > { %816 = vmatmul.bf16.gmra.mxu3 %v2434_v4  ;;  %2535 = vmatpush.bf16.msra.mxu2 %v2503_v60 }
  0x4f   : > { %666 = vmatmul.bf16.gmra.mxu2 %v2422_v0 }
  0x51   : > { %1099 = vmatpush.bf16.msra.mxu1 %v2466_v61  ;;  %1549 = vmatpush.bf16.msra.mxu0 %v2502_v1 }
  0x52   : > { %2536 = vmatpush.bf16.msra.mxu2 %v2502_v1 }
  0x55   : > { %1100 = vmatpush.bf16.msra.mxu1 %v2465_v2  ;;  %1550 = vmatpush.bf16.msra.mxu0 %v2501_v5 }
  0x56   : > { %2537 = vmatpush.bf16.msra.mxu2 %v2501_v5 }
  0x59   : > { %1101 = vmatpush.bf16.msra.mxu1 %v2464_v8  ;;  %1551 = vmatpush.bf16.msra.mxu0 %v2500_v10 }
  0x5a   : > { %2538 = vmatpush.bf16.msra.mxu2 %v2500_v10 }
  0x5c   : > { %511 = vmatmul.bf16.gmra.mxu1 %v2409_v13  ;;  %961 = vmatmul.bf16.gmra.mxu0 %v2445_v14 }
  0x5d   : > { %1102 = vmatpush.bf16.msra.mxu1 %v2463_v11  ;;  %1552 = vmatpush.bf16.msra.mxu0 %v2499_v18 }
  0x5e   : > { %821 = vmatmul.bf16.gmra.mxu3 %v2435_v16  ;;  %2539 = vmatpush.bf16.msra.mxu2 %v2499_v18 }
  0x5f   : > { %671 = vmatmul.bf16.gmra.mxu2 %v2423_v15 }
  0x61   : > { %1103 = vmatpush.bf16.msra.mxu1 %v2462_v12  ;;  %1553 = vmatpush.bf16.msra.mxu0 %v2498_v20 }
  0x62   : > { %2540 = vmatpush.bf16.msra.mxu2 %v2498_v20 }
  0x65   : > { %1104 = vmatpush.bf16.msra.mxu1 %v2461_v17  ;;  %1554 = vmatpush.bf16.msra.mxu0 %v2497_v22 }
  0x66   : > { %2541 = vmatpush.bf16.msra.mxu2 %v2497_v22 }
  0x69   : > { %1105 = vmatpush.bf16.msra.mxu1 %v2460_v21  ;;  %1555 = vmatpush.bf16.msra.mxu0 %v2496_v27 }
  0x6a   : > { %2542 = vmatpush.bf16.msra.mxu2 %v2496_v27 }
  0x6c   : > { %516 = vmatmul.bf16.gmra.mxu1 %v2410_v23  ;;  %966 = vmatmul.bf16.gmra.mxu0 %v2446_v24 }
  0x6e   : > { %1406 = vmatmul.bf16.vlgmr.msrb.gmra.mxu3 %v2480_v26 }
  0x6f   : > { %1256 = vmatmul.bf16.vlgmr.msrb.gmra.mxu2 %v2468_v25 }
  0x7c   : > { %521 = vmatmul.bf16.gmra.mxu1 %v2411_v28  ;;  %971 = vmatmul.bf16.gmra.mxu0 %v2447_v29 }
  0x7e   : > { %1411 = vmatmul.bf16.gmra.mxu3 %v2481_v31 }
  0x7f   : > { %1261 = vmatmul.bf16.gmra.mxu2 %v2469_v30 }
  0x8c   : > { %1106 = vmatmul.bf16.vlgmr.msra.gmra.mxu1 %v2456_v32  ;;  %1556 = vmatmul.bf16.vlgmr.msra.gmra.mxu0 %v2492_v33 }
  0x8e   : > { %1416 = vmatmul.bf16.gmra.mxu3 %v2482_v35 }
  0x8f   : > { %1266 = vmatmul.bf16.gmra.mxu2 %v2470_v34 }
  0x9c   : > { %1111 = vmatmul.bf16.gmra.mxu1 %v2457_v36  ;;  %1561 = vmatmul.bf16.gmra.mxu0 %v2493_v37 }
  0x9e   : > { %1421 = vmatmul.bf16.gmra.mxu3 %v2483_v39 }
  0x9f   : > { %1271 = vmatmul.bf16.gmra.mxu2 %v2471_v38 }
  0xa9   : > { %v383_v42 = vpop.f32.mrf.mxu1  ;;  %v373_v43 = vpop.f32.mrf.mxu0 }
  0xac   : > { %1116 = vmatmul.bf16.gmra.mxu1 %v2458_v40  ;;  %1566 = vmatmul.bf16.gmra.mxu0 %v2494_v41 }
  0xaf   : > { %1571 = vmatmul.bf16.vlgmr.msra.gmra.mxu2 %v2495_v44 }
  0xb1   : > { %v385_v46 = vpop.f32.mrf.mxu1  ;;  %v375_v47 = vpop.f32.mrf.mxu0 }
  0xb2   : > { %v657_v45 = vpop.f32.mrf.mxu2  ;;  %v807_v48 = vpop.f32.mrf.mxu3 }
  0xb9   : > { %v388_v51 = vpop.f32.mrf.mxu1  ;;  %v378_v52 = vpop.f32.mrf.mxu0 }
  0xba   : > { %v659_v50 = vpop.f32.mrf.mxu2  ;;  %v2899_v53 = vpop.f32.mrf.mxu3 }
  0xbc   : > { %1121 = vmatmul.bf16.gmra.mxu1 %v2459_v49 }
  0xc1   : > { %v390_v55 = vpop.f32.mrf.mxu1  ;;  %v380_v56 = vpop.f32.mrf.mxu0 }
  0xc2   : > { %v662_v54 = vpop.f32.mrf.mxu2  ;;  %v812_v57 = vpop.f32.mrf.mxu3 }
  0xc9   : > { %v507_v59 = vpop.f32.mrf.mxu1  ;;  %v957_v60 = vpop.f32.mrf.mxu0 }
  0xca   : > { %v664_v58 = vpop.f32.mrf.mxu2  ;;  %v535_v61 = vadd.f32 %v507_v59, %v373_v43  ;;  %v2901_v63 = vpop.f32.mrf.mxu3 }
  0xcc   : > { %v685_v62 = vadd.f32 %v657_v45, %v535_v61 }
  0xce   : > { %v835_v0 = vadd.f32 %v807_v48, %v685_v62 }
  0xd0   : > { %v985_v1 = vadd.f32 %v957_v60, %v835_v0 }
  0xd1   : > { %v509_v3 = vpop.f32.mrf.mxu1  ;;  %v959_v4 = vpop.f32.mrf.mxu0 }
  0xd2   : > { %v667_v2 = vpop.f32.mrf.mxu2  ;;  %v536_v5 = vadd.f32 %v509_v3, %v375_v47  ;;  %v817_v7 = vpop.f32.mrf.mxu3 }
  0xd4   : > { %v686_v6 = vadd.f32 %v659_v50, %v536_v5 }
  0xd9   : > { %v512_v9 = vpop.f32.mrf.mxu1  ;;  %v962_v10 = vpop.f32.mrf.mxu0 }
  0xda   : > { %v669_v8 = vpop.f32.mrf.mxu2  ;;  %v537_v11 = vadd.f32 %v512_v9, %v378_v52  ;;  %v2903_v16 = vpop.f32.mrf.mxu3  ;;  %v836_v52 = vadd.f32 %v2899_v53, %v686_v6 }
  0xdc   : > { %v687_v12 = vadd.f32 %v662_v54, %v537_v11 }
  0xde   : > { %v837_v13 = vadd.f32 %v812_v57, %v687_v12 }
  0xe0   : > { %v987_v14 = vadd.f32 %v962_v10, %v837_v13 }
  0xe1   : > { %v514_v17 = vpop.f32.mrf.mxu1  ;;  %v964_v18 = vpop.f32.mrf.mxu0 }
  0xe2   : > { %v672_v15 = vpop.f32.mrf.mxu2  ;;  %v538_v19 = vadd.f32 %v514_v17, %v380_v56  ;;  %v2905_v25 = vpop.f32.mrf.mxu3 }
  0xe4   : > { %v688_v20 = vadd.f32 %v664_v58, %v538_v19 }
  0xe9   : > { %v517_v22 = vpop.f32.mrf.mxu1  ;;  %v967_v23 = vpop.f32.mrf.mxu0 }
  0xea   : > { %v674_v21 = vpop.f32.mrf.mxu2  ;;  %v539_v24 = vadd.f32 %v517_v22, %v383_v42  ;;  %v2913_v34 = vpop.f32.mrf.mxu3 }
  0xec   : > { %v689_v26 = vadd.f32 %v667_v2, %v539_v24 }
  0xee   : > { %v839_v27 = vadd.f32 %v817_v7, %v689_v26 }
  0xf0   : > { %v2907_v28 = vadd.f32 %v967_v23, %v839_v27 }
  0xf1   : > { %v519_v30 = vpop.f32.mrf.mxu1  ;;  %v2909_v31 = vpop.f32.mrf.mxu0 }
  0xf2   : > { %v1257_v29 = vpop.f32.mrf.mxu2  ;;  %v540_v32 = vadd.f32 %v519_v30, %v385_v46  ;;  %v1407_v40 = vpop.f32.mrf.mxu3 }
  0xf4   : > { %v2911_v33 = vadd.f32 %v669_v8, %v540_v32  ;;  %v838_v8 = vadd.f32 %v2901_v63, %v688_v20 }
  0xf9   : > { %v522_v36 = vpop.f32.mrf.mxu1  ;;  %v2915_v37 = vpop.f32.mrf.mxu0 }
  0xfa   : > { %v1259_v35 = vpop.f32.mrf.mxu2  ;;  %v541_v38 = vadd.f32 %v522_v36, %v388_v51  ;;  %v1409_v46 = vpop.f32.mrf.mxu3  ;;  %v986_v51 = vadd.f32 %v959_v4, %v836_v52 }
  0xfc   : > { %v2917_v39 = vadd.f32 %v672_v15, %v541_v38  ;;  %v988_v15 = vadd.f32 %v964_v18, %v838_v8 }
 0x101   : > { %v524_v42 = vpop.f32.mrf.mxu1  ;;  %v2919_v43 = vpop.f32.mrf.mxu0 }
 0x102   : > { %v1262_v41 = vpop.f32.mrf.mxu2  ;;  %v542_v44 = vadd.f32 %v524_v42, %v390_v55  ;;  %v1412_v60 = vpop.f32.mrf.mxu3 }
 0x104   : > { %v2921_v45 = vadd.f32 %v674_v21, %v542_v44 }
 0x109   : > { %v1107_v47 = vpop.f32.mrf.mxu1  ;;  %v1557_v48 = vpop.f32.mrf.mxu0 }
 0x10a   : > { %v1135_v49 = vadd.f32 %v1107_v47, %v985_v1  ;;  %v1264_v50 = vpop.f32.mrf.mxu2  ;;  %v1414_v11 = vpop.f32.mrf.mxu3 }
 0x10c   : > { %v1285_v54 = vadd.f32 %v1257_v29, %v1135_v49 }
 0x10e   : > { %v1435_v56 = vadd.f32 %v1407_v40, %v1285_v54  ;;  %v840_v40 = vadd.f32 %v2903_v16, %v2911_v33 }
 0x110   : > { %v1585_v62 = vadd.f32 %v1557_v48, %v1435_v56 }
 0x111   : > { %v1109_v57 = vpop.f32.mrf.mxu1  ;;  %v1559_v58 = vpop.f32.mrf.mxu0 }
 0x112   : > { %v1136_v59 = vadd.f32 %v1109_v57, %v986_v51  ;;  %v1267_v55 = vpop.f32.mrf.mxu2  ;;  %v1639_v3 = vmul.f32 %v1585_v62, %v1585_v62 }
 0x114   : > { %v1286_v61 = vadd.f32 %v1259_v35, %v1136_v59 }
 0x116   : > { %v1436_v0 = vadd.f32 %v1409_v46, %v1286_v61  ;;  %v990_v46 = vadd.f32 %v2909_v31, %v840_v40 }
 0x118   : > { %v1586_v2 = vadd.f32 %v1559_v58, %v1436_v0 }
 0x119   : > { %v1112_v53 = vpop.f32.mrf.mxu1  ;;  %v1562_v1 = vpop.f32.mrf.mxu0 }
 0x11a   : > { %v2507_v4 = vpack.c.bf16 %v1586_v2, %v1585_v62  ;;  %v1625_v5 = vadd.f32 %v1586_v2, %v1585_v62  ;;  %v1640_v6 = vmul.f32 %v1586_v2, %v1586_v2  ;;  %v1137_v7 = vadd.f32 %v1112_v53, %v987_v14  ;;  %v1269_v13 = vpop.f32.mrf.mxu2  ;;  %v1417_v14 = vpop.f32.mrf.mxu3 }
 0x11b   : > { %v842_v2 = vadd.f32 %v2913_v34, %v2921_v45 }
 0x11c   : > { %2508 = vst [vmem:[%s2928_s19] sm:$0xff] %v2507_v4   ;;  %v1647_v9 = vadd.f32 %v1640_v6, %v1639_v3  ;;  %v1287_v10 = vadd.f32 %v1262_v41, %v1137_v7 }
 0x11e   : > { %v1437_v12 = vadd.f32 %v1412_v60, %v1287_v10 }
 0x120   : > { %v1587_v17 = vadd.f32 %v1562_v1, %v1437_v12  ;;  %v992_v1 = vadd.f32 %v2919_v43, %v842_v2 }
 0x121   : > { %v1114_v19 = vpop.f32.mrf.mxu1  ;;  %v1564_v21 = vpop.f32.mrf.mxu0 }
 0x122   : > { %v1626_v22 = vadd.f32 %v1625_v5, %v1587_v17  ;;  %v1641_v23 = vmul.f32 %v1587_v17, %v1587_v17  ;;  %v1138_v24 = vadd.f32 %v1114_v19, %v988_v15  ;;  %v1272_v63 = vpop.f32.mrf.mxu2  ;;  %v1419_v48 = vpop.f32.mrf.mxu3 }
 0x124   : > { %v1648_v26 = vadd.f32 %v1647_v9, %v1641_v23  ;;  %v1288_v27 = vadd.f32 %v1264_v50, %v1138_v24 }
 0x126   : > { %v1438_v29 = vadd.f32 %v1414_v11, %v1288_v27 }
 0x128   : > { %v1588_v30 = vadd.f32 %v1564_v21, %v1438_v29 }
 0x129   : > { %v1117_v20 = vpop.f32.mrf.mxu1  ;;  %v1567_v18 = vpop.f32.mrf.mxu0 }
 0x12a   : > { %v2512_v32 = vpack.c.bf16 %v1588_v30, %v1587_v17  ;;  %v1627_v35 = vadd.f32 %v1626_v22, %v1588_v30  ;;  %v1642_v36 = vmul.f32 %v1588_v30, %v1588_v30  ;;  %v1139_v38 = vadd.f32 %v1117_v20, %v2907_v28  ;;  %v1274_v51 = vpop.f32.mrf.mxu2  ;;  %v1422_v0 = vpop.f32.mrf.mxu3 }
 0x12b   : > { %v841_v28 = vadd.f32 %v2905_v25, %v2917_v39 }
 0x12c   : > { %2524 = vst [vmem:[%s2928_s19 + $0x8] sm:$0xff] %v2512_v32   ;;  %v1649_v41 = vadd.f32 %v1648_v26, %v1642_v36  ;;  %v1289_v42 = vadd.f32 %v1267_v55, %v1139_v38 }
 0x12d   : > { %v991_v58 = vadd.f32 %v2915_v37, %v841_v28 }
 0x12e   : > { %v1439_v44 = vadd.f32 %v1417_v14, %v1289_v42 }
 0x130   : > { %v1589_v47 = vadd.f32 %v1567_v18, %v1439_v44 }
 0x131   : > { %v1119_v49 = vpop.f32.mrf.mxu1  ;;  %v1569_v16 = vpop.f32.mrf.mxu0 }
 0x132   : > { %v1628_v50 = vadd.f32 %v1627_v35, %v1589_v47  ;;  %v1643_v52 = vmul.f32 %v1589_v47, %v1589_v47  ;;  %v1140_v54 = vadd.f32 %v1119_v49, %v990_v46  ;;  %v1572_v25 = vpop.f32.mrf.mxu2  ;;  %v1424_v10 = vpop.f32.mrf.mxu3 }
 0x134   : > { %v1650_v56 = vadd.f32 %v1649_v41, %v1643_v52  ;;  %v1290_v57 = vadd.f32 %v1269_v13, %v1140_v54 }
 0x136   : > { %v1440_v33 = vadd.f32 %v1419_v48, %v1290_v57 }
 0x138   : > { %v1590_v59 = vadd.f32 %v1569_v16, %v1440_v33 }
 0x139   : > { %v1122_v60 = vpop.f32.mrf.mxu1 }
 0x13a   : > { %v2517_v31 = vpack.c.bf16 %v1590_v59, %v1589_v47  ;;  %v1629_v61 = vadd.f32 %v1628_v50, %v1590_v59  ;;  %v1644_v62 = vmul.f32 %v1590_v59, %v1590_v59  ;;  %v1141_v55 = vadd.f32 %v1122_v60, %v991_v58  ;;  %v1574_v12 = vpop.f32.mrf.mxu2 }
 0x13c   : > { %2525 = vst [vmem:[%s2928_s19 + $0x10] sm:$0xff] %v2517_v31   ;;  %v1651_v3 = vadd.f32 %v1650_v56, %v1644_v62  ;;  %v1291_v53 = vadd.f32 %v1272_v63, %v1141_v55 }
 0x13e   : > { %v1441_v39 = vadd.f32 %v1422_v0, %v1291_v53 }
 0x140   : > { %v1591_v4 = vadd.f32 %v1572_v25, %v1441_v39 }
 0x141   : > { %v1124_v37 = vpop.f32.mrf.mxu1 }
 0x142   : > { %v1630_v5 = vadd.f32 %v1629_v61, %v1591_v4  ;;  %v1645_v6 = vmul.f32 %v1591_v4, %v1591_v4  ;;  %v1142_v7 = vadd.f32 %v1124_v37, %v992_v1 }
 0x144   : > { %v1652_v8 = vadd.f32 %v1651_v3, %v1645_v6  ;;  %v1292_v9 = vadd.f32 %v1274_v51, %v1142_v7 }
 0x146   : > { %v1442_v11 = vadd.f32 %v1424_v10, %v1292_v9 }
 0x148   : > { %v1592_v34 = vadd.f32 %v1574_v12, %v1442_v11 }
 0x14a   : > { %v2522_v45 = vpack.c.bf16 %v1592_v34, %v1591_v4  ;;  %v1631_v13 = vadd.f32 %v1630_v5, %v1592_v34  ;;  %v1646_v15 = vmul.f32 %v1592_v34, %v1592_v34 }
 0x14c   : > { %2526 = vst [vmem:[%s2928_s19 + $0x18] sm:$0xff] %v2522_v45   ;;  %v1632_v17 = vrot.slane %v1631_v13, 4  ;;  %v1653_v19 = vadd.f32 %v1652_v8, %v1646_v15 }
 0x14e   : > { %v1633_v43 = vadd.f32 %v1632_v17, %v1631_v13  ;;  %v1654_v21 = vrot.slane %v1653_v19, 4 }
 0x150   : > { %v1634_v22 = vrot.slane %v1633_v43, 2  ;;  %v1655_v23 = vadd.f32 %v1654_v21, %v1653_v19 }
 0x152   : > { %v1635_v24 = vadd.f32 %v1634_v22, %v1633_v43  ;;  %v1656_v26 = vrot.slane %v1655_v23, 2 }
 0x154   : > { %v1636_v27 = vrot.slane %v1635_v24, 1  ;;  %v1657_v29 = vadd.f32 %v1656_v26, %v1655_v23 }
 0x156   : > { %v1637_v14 = vadd.f32 %v1636_v27, %v1635_v24  ;;  %v1658_v30 = vrot.slane %v1657_v29, 1 }
 0x158   : > { %1638 = vst [vmem:[%s261_s23] sm:$0x1] %v1637_v14  ;;  %v1659_v63 = vadd.f32 %v1658_v30, %v1657_v29 }
 0x15a   : > { %1660 = vst [vmem:[%s267_s26] sm:$0x1] %v1659_v63 }
 0x15b PF: > { %s15_s17 = sadd.s32 1, %s2590_s17   ;;  %s2967_s15 = smov %s2586_s16 }
 0x15c   : > { %p12_p5 = scmp.ge.s32.totalorder %s15_s17, 4   ;;  %s2968_s16 = smov %s2970_s18 }
 0x15e   :  { %14 = sbr.rel (!%p12_p5) target bundleno = 2 (0x2), region = 93 }

// kernel: basic_block_forward.3
= control target key start
LH: loop header
LB: loop body
LE: loop exit
PB: predicated region body
PF: predicated region fallthrough
CT: control target
= control target key end

     0   :  { %s2724_s15 = smov 0   ;;  %s2726_s16 = smov 0   ;;  %s3123_s0 = inlined_call_operand.vmem [shape: bf16[2,240,128], index: 0, kind: input, shape index: {}]   ;;  %s3124_s1 = inlined_call_operand.vmem [shape: bf16[9,128,128], index: 1, kind: input, shape index: {}]   ;;  %s3125_s2 = inlined_call_operand.vmem [shape: bf16[2,64,128], index: 2, kind: input, shape index: {}]   ;;  %s3126_s3 = inlined_call_operand.vmem [shape: bf16[128,128], index: 3, kind: input, shape index: {}]   ;;  %s3127_s4 = inlined_call_operand.vmem [shape: f32[2,64,128], index: 4, kind: output, shape index: {}]  }
   0x1   :  { %s2728_s17 = smov 0  }
   0x2 LB: > { %s26_s18 = sadd.s32 1, %s2693_s16  ;;  %p1896_p0 = scmp.ge.s32.totalorder %s2697_s17, 1  ;;  %s2697_s17 = sphi %s2728_s17, %s14_s17   ;;  %s2693_s16 = sphi %s2726_s16, %s3129_s16   ;;  %s2689_s15 = sphi %s2724_s15, %s3128_s15  }
   0x3   : > { %p28_p1 = scmp.ge.s32.totalorder %s26_s18, 2  ;;  %p204_p2 = scmp.lt.s32.totalorder %s2697_s17, 3 }
   0x5   : > { %s3131_s18 = smov (%p28_p1, %s26_s18), 0  ;;  %p205_p3 = pnand %p1896_p0, %p204_p2 }
   0x6   : > { %p246_p4 = scmp.lt.s32.totalorder (!%p205_p3), %s2689_s15, 1 }
   0x7   : > { %208 = sbr.rel (%p205_p3) target bundleno = 337 (0x151), region = 36 }
   0xc   : > { %v2525_v0 = vld [vmem:[%s3124_s1 + $0x38] sm:$0xff]  ;;  %v2524_v2 = vld [vmem:[%s3124_s1 + $0x30] sm:$0xff]  ;;  %v2523_v4 = vld [vmem:[%s3124_s1 + $0x28] sm:$0xff]  ;;  %s3133_s15 = smov (!%p246_p4, %s2689_s15), 1 }
   0xd   : > { %v2537_v1 = vld [vmem:[%s3124_s1 + $0x78] sm:$0xff]  ;;  %2634 = vmatpush.bf16.msra.mxu2 %v2525_v0  ;;  %v2536_v3 = vld [vmem:[%s3124_s1 + $0x70] sm:$0xff]  ;;  %368 = vmatpush.bf16.msra.mxu0 %v2525_v0  ;;  %v2535_v5 = vld [vmem:[%s3124_s1 + $0x68] sm:$0xff]  ;;  %s2650_s25 = smul.u32 120, %s3133_s15  ;;  %s2512_s9 = sshll.u32 %s3133_s15, 5 }
   0xe   : > { %2642 = vmatpush.bf16.msra.mxu3 %v2537_v1  ;;  %502 = vmatpush.bf16.msra.mxu1 %v2537_v1  ;;  %v2522_v6 = vld [vmem:[%s3124_s1 + $0x20] sm:$0xff]  ;;  %v2521_v8 = vld [vmem:[%s3124_s1 + $0x18] sm:$0xff]  ;;  %v2520_v10 = vld [vmem:[%s3124_s1 + $0x10] sm:$0xff]  ;;  %s3022_s12 = scalar_lea.vmem %s3125_s2, %s2512_s9 }
   0xf   : > { %v2534_v7 = vld [vmem:[%s3124_s1 + $0x60] sm:$0xff]  ;;  %v2533_v9 = vld [vmem:[%s3124_s1 + $0x58] sm:$0xff]  ;;  %v2532_v11 = vld [vmem:[%s3124_s1 + $0x50] sm:$0xff]  ;;  %s2800_s6 = scalar_lea.vmem %s3123_s0, %s2650_s25 }
  0x10   : > { %v2519_v12 = vld [vmem:[%s3124_s1 + $0x8] sm:$0xff]  ;;  %v2518_v14 = vld [vmem:[%s3124_s1] sm:$0xff]  ;;  %v2549_v16 = vld [vmem:[%s3124_s1 + $0xb8] sm:$0xff] }
  0x11   : > { %2635 = vmatpush.bf16.msra.mxu2 %v2524_v2  ;;  %369 = vmatpush.bf16.msra.mxu0 %v2524_v2  ;;  %v2531_v13 = vld [vmem:[%s3124_s1 + $0x48] sm:$0xff]  ;;  %v2530_v15 = vld [vmem:[%s3124_s1 + $0x40] sm:$0xff]  ;;  %v2561_v17 = vld [vmem:[%s3124_s1 + $0xf8] sm:$0xff] }
  0x12   : > { %2643 = vmatpush.bf16.msra.mxu3 %v2536_v3  ;;  %503 = vmatpush.bf16.msra.mxu1 %v2536_v3  ;;  %v2516_v18 = vld [vmem:[%s2800_s6 + $0x10] sm:$0xff]  ;;  %v2528_v19 = vld [vmem:[%s2800_s6 + $0x38] sm:$0xff]  ;;  %v2514_v20 = vld [vmem:[%s2800_s6] sm:$0xff] }
  0x13   : > { %v2526_v21 = vld [vmem:[%s2800_s6 + $0x28] sm:$0xff]  ;;  %v2573_v22 = vld [vmem:[%s3124_s1 + $0x138] sm:$0xff]  ;;  %v2548_v24 = vld [vmem:[%s3124_s1 + $0xb0] sm:$0xff] }
  0x14   : > { %v2585_v23 = vld [vmem:[%s3124_s1 + $0x178] sm:$0xff]  ;;  %v2560_v25 = vld [vmem:[%s3124_s1 + $0xf0] sm:$0xff]  ;;  %v2547_v28 = vld [vmem:[%s3124_s1 + $0xa8] sm:$0xff] }
  0x15   : > { %2636 = vmatpush.bf16.msra.mxu2 %v2523_v4  ;;  %370 = vmatpush.bf16.msra.mxu0 %v2523_v4  ;;  %v2572_v26 = vld [vmem:[%s3124_s1 + $0x130] sm:$0xff]  ;;  %v2559_v29 = vld [vmem:[%s3124_s1 + $0xe8] sm:$0xff]  ;;  %v2546_v32 = vld [vmem:[%s3124_s1 + $0xa0] sm:$0xff] }
  0x16   : > { %2644 = vmatpush.bf16.msra.mxu3 %v2535_v5  ;;  %504 = vmatpush.bf16.msra.mxu1 %v2535_v5  ;;  %v2584_v27 = vld [vmem:[%s3124_s1 + $0x170] sm:$0xff]  ;;  %v2571_v30 = vld [vmem:[%s3124_s1 + $0x128] sm:$0xff]  ;;  %v2558_v33 = vld [vmem:[%s3124_s1 + $0xe0] sm:$0xff] }
  0x17   : > { %v2583_v31 = vld [vmem:[%s3124_s1 + $0x168] sm:$0xff]  ;;  %v2570_v34 = vld [vmem:[%s3124_s1 + $0x120] sm:$0xff]  ;;  %v2545_v36 = vld [vmem:[%s3124_s1 + $0x98] sm:$0xff] }
  0x18   : > { %v2582_v35 = vld [vmem:[%s3124_s1 + $0x160] sm:$0xff]  ;;  %v2557_v37 = vld [vmem:[%s3124_s1 + $0xd8] sm:$0xff]  ;;  %v2515_v40 = vld [vmem:[%s2800_s6 + $0x8] sm:$0xff] }
  0x19   : > { %2637 = vmatpush.bf16.msra.mxu2 %v2522_v6  ;;  %371 = vmatpush.bf16.msra.mxu0 %v2522_v6  ;;  %v2517_v38 = vld [vmem:[%s2800_s6 + $0x18] sm:$0xff]  ;;  %v2529_v39 = vld [vmem:[%s2800_s6 + $0x40] sm:$0xff]  ;;  %v2527_v41 = vld [vmem:[%s2800_s6 + $0x30] sm:$0xff] }
  0x1a   : > { %2645 = vmatpush.bf16.msra.mxu3 %v2534_v7  ;;  %505 = vmatpush.bf16.msra.mxu1 %v2534_v7  ;;  %v2569_v42 = vld [vmem:[%s3124_s1 + $0x118] sm:$0xff]  ;;  %v2544_v44 = vld [vmem:[%s3124_s1 + $0x90] sm:$0xff]  ;;  %v2543_v48 = vld [vmem:[%s3124_s1 + $0x88] sm:$0xff] }
  0x1b   : > { %v2581_v43 = vld [vmem:[%s3124_s1 + $0x158] sm:$0xff]  ;;  %v2556_v45 = vld [vmem:[%s3124_s1 + $0xd0] sm:$0xff]  ;;  %v2555_v49 = vld [vmem:[%s3124_s1 + $0xc8] sm:$0xff] }
  0x1c   : > { %v2568_v46 = vld [vmem:[%s3124_s1 + $0x110] sm:$0xff]  ;;  %v2567_v50 = vld [vmem:[%s3124_s1 + $0x108] sm:$0xff]  ;;  %v2542_v52 = vld [vmem:[%s3124_s1 + $0x80] sm:$0xff] }
  0x1d   : > { %2638 = vmatpush.bf16.msra.mxu2 %v2521_v8  ;;  %372 = vmatpush.bf16.msra.mxu0 %v2521_v8  ;;  %v2580_v47 = vld [vmem:[%s3124_s1 + $0x150] sm:$0xff]  ;;  %v2579_v51 = vld [vmem:[%s3124_s1 + $0x148] sm:$0xff]  ;;  %v2554_v53 = vld [vmem:[%s3124_s1 + $0xc0] sm:$0xff] }
  0x1e   : > { %2646 = vmatpush.bf16.msra.mxu3 %v2533_v9  ;;  %506 = vmatpush.bf16.msra.mxu1 %v2533_v9  ;;  %v2597_v54 = vld [vmem:[%s3124_s1 + $0x1b8] sm:$0xff]  ;;  %v2566_v56 = vld [vmem:[%s3124_s1 + $0x100] sm:$0xff]  ;;  %v2538_v60 = vld [vmem:[%s2800_s6 + $0x50] sm:$0xff] }
  0x1f   : > { %v2609_v55 = vld [vmem:[%s3124_s1 + $0x1f8] sm:$0xff]  ;;  %v2578_v57 = vld [vmem:[%s3124_s1 + $0x140] sm:$0xff]  ;;  %v2562_v62 = vld [vmem:[%s2800_s6 + $0x2c] sm:$0xff] }
  0x20   : > { %v2621_v58 = vld [vmem:[%s3124_s1 + $0x238] sm:$0xff]  ;;  %v2550_v61 = vld [vmem:[%s2800_s6 + $0x4] sm:$0xff]  ;;  %v2596_v0 = vld [vmem:[%s3124_s1 + $0x1b0] sm:$0xff] }
  0x21   : > { %2639 = vmatpush.bf16.msra.mxu2 %v2520_v10  ;;  %373 = vmatpush.bf16.msra.mxu0 %v2520_v10  ;;  %v2633_v59 = vld [vmem:[%s3126_s3 + $0x38] sm:$0xff]  ;;  %v2608_v1 = vld [vmem:[%s3124_s1 + $0x1f0] sm:$0xff]  ;;  %v2595_v4 = vld [vmem:[%s3124_s1 + $0x1a8] sm:$0xff] }
  0x22   : > { %2647 = vmatpush.bf16.msra.mxu3 %v2532_v11  ;;  %507 = vmatpush.bf16.msra.mxu1 %v2532_v11  ;;  %v2574_v63 = vld [vmem:[%s2800_s6 + $0x54] sm:$0xff]  ;;  %v2607_v5 = vld [vmem:[%s3124_s1 + $0x1e8] sm:$0xff]  ;;  %v2594_v8 = vld [vmem:[%s3124_s1 + $0x1a0] sm:$0xff] }
  0x23   : > { %v2620_v2 = vld [vmem:[%s3124_s1 + $0x230] sm:$0xff]  ;;  %v2619_v6 = vld [vmem:[%s3124_s1 + $0x228] sm:$0xff]  ;;  %v2606_v9 = vld [vmem:[%s3124_s1 + $0x1e0] sm:$0xff] }
  0x24   : > { %v2632_v3 = vld [vmem:[%s3126_s3 + $0x30] sm:$0xff]  ;;  %v2631_v7 = vld [vmem:[%s3126_s3 + $0x28] sm:$0xff]  ;;  %v2618_v10 = vld [vmem:[%s3124_s1 + $0x220] sm:$0xff] }
  0x25   : > { %2640 = vmatpush.bf16.msra.mxu2 %v2519_v12  ;;  %374 = vmatpush.bf16.msra.mxu0 %v2519_v12  ;;  %v2630_v11 = vld [vmem:[%s3126_s3 + $0x20] sm:$0xff]  ;;  %v2593_v12 = vld [vmem:[%s3124_s1 + $0x198] sm:$0xff] }
  0x26   : > { %2648 = vmatpush.bf16.msra.mxu3 %v2531_v13  ;;  %508 = vmatpush.bf16.msra.mxu1 %v2531_v13  ;;  %v2605_v13 = vld [vmem:[%s3124_s1 + $0x1d8] sm:$0xff] }
  0x29   : > { %2641 = vmatpush.bf16.msra.mxu2 %v2518_v14  ;;  %375 = vmatpush.bf16.msra.mxu0 %v2518_v14  ;;  %v2617_v14 = vld [vmem:[%s3124_s1 + $0x218] sm:$0xff] }
  0x2a   : > { %2649 = vmatpush.bf16.msra.mxu3 %v2530_v15  ;;  %509 = vmatpush.bf16.msra.mxu1 %v2530_v15  ;;  %v2629_v15 = vld [vmem:[%s3126_s3 + $0x18] sm:$0xff] }
  0x2c   : > { %386 = vmatmul.bf16.vlgmr.msra.gmra.mxu2 %v2516_v18  ;;  %376 = vmatmul.bf16.vlgmr.msra.gmra.mxu0 %v2514_v20  ;;  %v2563_v18 = vld [vmem:[%s2800_s6 + $0x34] sm:$0xff] }
  0x2d   : > { %652 = vmatpush.bf16.msrb.mxu2 %v2549_v16  ;;  %520 = vmatmul.bf16.vlgmr.msra.gmra.mxu3 %v2528_v19  ;;  %v2539_v16 = vld [vmem:[%s2800_s6 + $0x58] sm:$0xff]  ;;  %v2592_v20 = vld [vmem:[%s3124_s1 + $0x190] sm:$0xff] }
  0x2e   : > { %802 = vmatpush.bf16.msrb.mxu3 %v2561_v17  ;;  %510 = vmatmul.bf16.vlgmr.msra.gmra.mxu1 %v2526_v21  ;;  %v2551_v17 = vld [vmem:[%s2800_s6 + $0xc] sm:$0xff]  ;;  %v2575_v19 = vld [vmem:[%s2800_s6 + $0x5c] sm:$0xff] }
  0x2f   : > { %952 = vmatpush.bf16.msrb.mxu0 %v2573_v22  ;;  %1102 = vmatpush.bf16.msrb.mxu1 %v2585_v23  ;;  %v2604_v21 = vld [vmem:[%s3124_s1 + $0x1d0] sm:$0xff]  ;;  %v2591_v23 = vld [vmem:[%s3124_s1 + $0x188] sm:$0xff] }
  0x30   : > { %v2616_v22 = vld [vmem:[%s3124_s1 + $0x210] sm:$0xff] }
  0x31   : > { %653 = vmatpush.bf16.msrb.mxu2 %v2548_v24  ;;  %v2603_v24 = vld [vmem:[%s3124_s1 + $0x1c8] sm:$0xff] }
  0x32   : > { %803 = vmatpush.bf16.msrb.mxu3 %v2560_v25  ;;  %v2628_v25 = vld [vmem:[%s3126_s3 + $0x10] sm:$0xff] }
  0x33   : > { %953 = vmatpush.bf16.msrb.mxu0 %v2572_v26  ;;  %1103 = vmatpush.bf16.msrb.mxu1 %v2584_v27  ;;  %v2615_v26 = vld [vmem:[%s3124_s1 + $0x208] sm:$0xff] }
  0x34   : > { %v2627_v27 = vld [vmem:[%s3126_s3 + $0x8] sm:$0xff] }
  0x35   : > { %654 = vmatpush.bf16.msrb.mxu2 %v2547_v28  ;;  %v2590_v28 = vld [vmem:[%s3124_s1 + $0x180] sm:$0xff] }
  0x36   : > { %804 = vmatpush.bf16.msrb.mxu3 %v2559_v29  ;;  %v2602_v29 = vld [vmem:[%s3124_s1 + $0x1c0] sm:$0xff] }
  0x37   : > { %954 = vmatpush.bf16.msrb.mxu0 %v2571_v30  ;;  %1104 = vmatpush.bf16.msrb.mxu1 %v2583_v31  ;;  %v2614_v30 = vld [vmem:[%s3124_s1 + $0x200] sm:$0xff] }
  0x38   : > { %v2540_v31 = vld [vmem:[%s2800_s6 + $0x60] sm:$0xff] }
  0x39   : > { %655 = vmatpush.bf16.msrb.mxu2 %v2546_v32  ;;  %v2552_v32 = vld [vmem:[%s2800_s6 + $0x14] sm:$0xff] }
  0x3a   : > { %805 = vmatpush.bf16.msrb.mxu3 %v2558_v33  ;;  %v2564_v33 = vld [vmem:[%s2800_s6 + $0x3c] sm:$0xff] }
  0x3b   : > { %955 = vmatpush.bf16.msrb.mxu0 %v2570_v34  ;;  %1105 = vmatpush.bf16.msrb.mxu1 %v2582_v35  ;;  %v2576_v34 = vld [vmem:[%s2800_s6 + $0x64] sm:$0xff] }
  0x3c   : > { %391 = vmatmul.bf16.gmra.mxu2 %v2517_v38  ;;  %381 = vmatmul.bf16.gmra.mxu0 %v2515_v40  ;;  %v2626_v35 = vld [vmem:[%s3126_s3] sm:$0xff]  ;;  %v2586_v40 = vld [vmem:[%s2800_s6 + $0x8] sm:$0xff] }
  0x3d   : > { %656 = vmatpush.bf16.msrb.mxu2 %v2545_v36  ;;  %525 = vmatmul.bf16.gmra.mxu3 %v2529_v39  ;;  %v2541_v36 = vld [vmem:[%s2800_s6 + $0x68] sm:$0xff] }
  0x3e   : > { %806 = vmatpush.bf16.msrb.mxu3 %v2557_v37  ;;  %515 = vmatmul.bf16.gmra.mxu1 %v2527_v41  ;;  %v2553_v37 = vld [vmem:[%s2800_s6 + $0x1c] sm:$0xff]  ;;  %v2565_v38 = vld [vmem:[%s2800_s6 + $0x44] sm:$0xff]  ;;  %v2577_v39 = vld [vmem:[%s2800_s6 + $0x6c] sm:$0xff] }
  0x3f   : > { %956 = vmatpush.bf16.msrb.mxu0 %v2569_v42  ;;  %1106 = vmatpush.bf16.msrb.mxu1 %v2581_v43  ;;  %v2598_v41 = vld [vmem:[%s2800_s6 + $0x30] sm:$0xff]  ;;  %v2610_v42 = vld [vmem:[%s2800_s6 + $0x58] sm:$0xff]  ;;  %v2622_v43 = vld [vmem:[%s3022_s12] sm:$0xff] }
  0x41   : > { %657 = vmatpush.bf16.msrb.mxu2 %v2544_v44  ;;  %v2587_v44 = vld [vmem:[%s2800_s6 + $0x10] sm:$0xff] }
  0x42   : > { %807 = vmatpush.bf16.msrb.mxu3 %v2556_v45  ;;  %v2599_v45 = vld [vmem:[%s2800_s6 + $0x38] sm:$0xff] }
  0x43   : > { %957 = vmatpush.bf16.msrb.mxu0 %v2568_v46  ;;  %1107 = vmatpush.bf16.msrb.mxu1 %v2580_v47  ;;  %v2611_v46 = vld [vmem:[%s2800_s6 + $0x60] sm:$0xff]  ;;  %v2623_v47 = vld [vmem:[%s3022_s12 + $0x8] sm:$0xff] }
  0x45   : > { %658 = vmatpush.bf16.msrb.mxu2 %v2543_v48  ;;  %v2588_v48 = vld [vmem:[%s2800_s6 + $0x18] sm:$0xff] }
  0x46   : > { %808 = vmatpush.bf16.msrb.mxu3 %v2555_v49  ;;  %v2600_v49 = vld [vmem:[%s2800_s6 + $0x40] sm:$0xff] }
  0x47   : > { %958 = vmatpush.bf16.msrb.mxu0 %v2567_v50  ;;  %1108 = vmatpush.bf16.msrb.mxu1 %v2579_v51  ;;  %v2612_v50 = vld [vmem:[%s2800_s6 + $0x68] sm:$0xff]  ;;  %v2624_v51 = vld [vmem:[%s3022_s12 + $0x10] sm:$0xff] }
  0x49   : > { %659 = vmatpush.bf16.msrb.mxu2 %v2542_v52 }
  0x4a   : > { %809 = vmatpush.bf16.msrb.mxu3 %v2554_v53 }
  0x4b   : > { %959 = vmatpush.bf16.msrb.mxu0 %v2566_v56  ;;  %1109 = vmatpush.bf16.msrb.mxu1 %v2578_v57 }
  0x4c   : > { %660 = vmatmul.bf16.vlgmr.msrb.gmra.mxu2 %v2538_v60 }
  0x4d   : > { %1252 = vmatpush.bf16.msra.mxu2 %v2597_v54  ;;  %810 = vmatmul.bf16.vlgmr.msrb.gmra.mxu3 %v2550_v61 }
  0x4e   : > { %1402 = vmatpush.bf16.msra.mxu3 %v2609_v55  ;;  %960 = vmatmul.bf16.vlgmr.msrb.gmra.mxu0 %v2562_v62 }
  0x4f   : > { %1552 = vmatpush.bf16.msra.mxu0 %v2621_v58  ;;  %1709 = vmatpush.bf16.msra.mxu1 %v2633_v59 }
  0x50   : > { %1110 = vmatmul.bf16.vlgmr.msrb.gmra.mxu1 %v2574_v63 }
  0x51   : > { %1253 = vmatpush.bf16.msra.mxu2 %v2596_v0  ;;  %v2589_v0 = vld [vmem:[%s2800_s6 + $0x20] sm:$0xff] }
  0x52   : > { %1403 = vmatpush.bf16.msra.mxu3 %v2608_v1  ;;  %v2601_v1 = vld [vmem:[%s2800_s6 + $0x48] sm:$0xff] }
  0x53   : > { %1553 = vmatpush.bf16.msra.mxu0 %v2620_v2  ;;  %1710 = vmatpush.bf16.msra.mxu1 %v2632_v3  ;;  %v2613_v2 = vld [vmem:[%s2800_s6 + $0x70] sm:$0xff]  ;;  %v2625_v3 = vld [vmem:[%s3022_s12 + $0x18] sm:$0xff]  ;;  %s2513_s6 = sshll.u32 %s3133_s15, 6 }
  0x54   : > { %s3084_s19 = scalar_lea.vmem %s3127_s4, %s2513_s6 }
  0x55   : > { %1254 = vmatpush.bf16.msra.mxu2 %v2595_v4 }
  0x56   : > { %1404 = vmatpush.bf16.msra.mxu3 %v2607_v5 }
  0x57   : > { %1554 = vmatpush.bf16.msra.mxu0 %v2619_v6  ;;  %1711 = vmatpush.bf16.msra.mxu1 %v2631_v7 }
  0x59   : > { %1255 = vmatpush.bf16.msra.mxu2 %v2594_v8 }
  0x5a   : > { %1405 = vmatpush.bf16.msra.mxu3 %v2606_v9 }
  0x5b   : > { %1555 = vmatpush.bf16.msra.mxu0 %v2618_v10  ;;  %1712 = vmatpush.bf16.msra.mxu1 %v2630_v11 }
  0x5c   : > { %665 = vmatmul.bf16.gmra.mxu2 %v2539_v16 }
  0x5d   : > { %1256 = vmatpush.bf16.msra.mxu2 %v2593_v12  ;;  %815 = vmatmul.bf16.gmra.mxu3 %v2551_v17 }
  0x5e   : > { %1406 = vmatpush.bf16.msra.mxu3 %v2605_v13  ;;  %965 = vmatmul.bf16.gmra.mxu0 %v2563_v18 }
  0x5f   : > { %1556 = vmatpush.bf16.msra.mxu0 %v2617_v14  ;;  %1713 = vmatpush.bf16.msra.mxu1 %v2629_v15 }
  0x60   : > { %1115 = vmatmul.bf16.gmra.mxu1 %v2575_v19 }
  0x61   : > { %1257 = vmatpush.bf16.msra.mxu2 %v2592_v20 }
  0x62   : > { %1407 = vmatpush.bf16.msra.mxu3 %v2604_v21 }
  0x63   : > { %1557 = vmatpush.bf16.msra.mxu0 %v2616_v22  ;;  %1714 = vmatpush.bf16.msra.mxu1 %v2628_v25 }
  0x65   : > { %1258 = vmatpush.bf16.msra.mxu2 %v2591_v23 }
  0x66   : > { %1408 = vmatpush.bf16.msra.mxu3 %v2603_v24 }
  0x67   : > { %1558 = vmatpush.bf16.msra.mxu0 %v2615_v26  ;;  %1715 = vmatpush.bf16.msra.mxu1 %v2627_v27 }
  0x69   : > { %1259 = vmatpush.bf16.msra.mxu2 %v2590_v28 }
  0x6a   : > { %1409 = vmatpush.bf16.msra.mxu3 %v2602_v29 }
  0x6b   : > { %1559 = vmatpush.bf16.msra.mxu0 %v2614_v30  ;;  %1716 = vmatpush.bf16.msra.mxu1 %v2626_v35 }
  0x6c   : > { %670 = vmatmul.bf16.gmra.mxu2 %v2540_v31 }
  0x6d   : > { %820 = vmatmul.bf16.gmra.mxu3 %v2552_v32 }
  0x6e   : > { %970 = vmatmul.bf16.gmra.mxu0 %v2564_v33 }
  0x70   : > { %1120 = vmatmul.bf16.gmra.mxu1 %v2576_v34 }
  0x7c   : > { %675 = vmatmul.bf16.gmra.mxu2 %v2541_v36 }
  0x7d   : > { %825 = vmatmul.bf16.gmra.mxu3 %v2553_v37 }
  0x7e   : > { %975 = vmatmul.bf16.gmra.mxu0 %v2565_v38 }
  0x80   : > { %1125 = vmatmul.bf16.gmra.mxu1 %v2577_v39 }
  0x8c   : > { %1260 = vmatmul.bf16.vlgmr.msra.gmra.mxu2 %v2586_v40 }
  0x8d   : > { %1410 = vmatmul.bf16.vlgmr.msra.gmra.mxu3 %v2598_v41 }
  0x8e   : > { %1560 = vmatmul.bf16.vlgmr.msra.gmra.mxu0 %v2610_v42 }
  0x90   : > { %1717 = vmatmul.bf16.vlgmr.msra.gmra.mxu1 %v2622_v43 }
  0x9c   : > { %1265 = vmatmul.bf16.gmra.mxu2 %v2587_v44 }
  0x9d   : > { %1415 = vmatmul.bf16.gmra.mxu3 %v2599_v45 }
  0x9e   : > { %1565 = vmatmul.bf16.gmra.mxu0 %v2611_v46 }
  0xa0   : > { %1722 = vmatmul.bf16.gmra.mxu1 %v2623_v47 }
  0xa9   : > { %v377_v52 = vpop.f32.mrf.mxu0 }
  0xab   : > { %v511_v53 = vpop.f32.mrf.mxu1 }
  0xac   : > { %v539_v54 = vadd.f32 %v511_v53, %v377_v52  ;;  %1270 = vmatmul.bf16.gmra.mxu2 %v2588_v48 }
  0xad   : > { %1420 = vmatmul.bf16.gmra.mxu3 %v2600_v49 }
  0xae   : > { %1570 = vmatmul.bf16.gmra.mxu0 %v2612_v50 }
  0xaf   : > { %v387_v55 = vpop.f32.mrf.mxu2 }
  0xb0   : > { %1727 = vmatmul.bf16.gmra.mxu1 %v2624_v51  ;;  %v521_v56 = vpop.f32.mrf.mxu3 }
  0xb1   : > { %v3036_v57 = vadd.f32 %v521_v56, %v387_v55  ;;  %v379_v58 = vpop.f32.mrf.mxu0 }
  0xb3   : > { %v513_v59 = vpop.f32.mrf.mxu1 }
  0xb4   : > { %v540_v60 = vadd.f32 %v513_v59, %v379_v58 }
  0xb7   : > { %v389_v61 = vpop.f32.mrf.mxu2 }
  0xb8   : > { %v523_v62 = vpop.f32.mrf.mxu3 }
  0xb9   : > { %v3038_v63 = vadd.f32 %v523_v62, %v389_v61  ;;  %v382_v4 = vpop.f32.mrf.mxu0 }
  0xbb   : > { %v516_v5 = vpop.f32.mrf.mxu1 }
  0xbc   : > { %v541_v6 = vadd.f32 %v516_v5, %v382_v4  ;;  %1275 = vmatmul.bf16.gmra.mxu2 %v2589_v0 }
  0xbd   : > { %1425 = vmatmul.bf16.gmra.mxu3 %v2601_v1 }
  0xbe   : > { %1575 = vmatmul.bf16.gmra.mxu0 %v2613_v2 }
  0xbf   : > { %v392_v7 = vpop.f32.mrf.mxu2 }
  0xc0   : > { %1732 = vmatmul.bf16.gmra.mxu1 %v2625_v3  ;;  %v526_v8 = vpop.f32.mrf.mxu3 }
  0xc1   : > { %v3044_v9 = vadd.f32 %v526_v8, %v392_v7  ;;  %v384_v10 = vpop.f32.mrf.mxu0 }
  0xc3   : > { %v518_v11 = vpop.f32.mrf.mxu1 }
  0xc4   : > { %v3046_v12 = vadd.f32 %v518_v11, %v384_v10 }
  0xc7   : > { %v394_v13 = vpop.f32.mrf.mxu2 }
  0xc8   : > { %v528_v14 = vpop.f32.mrf.mxu3 }
  0xc9   : > { %v3048_v15 = vadd.f32 %v528_v14, %v394_v13 }
  0xcb   : > { %v961_v16 = vpop.f32.mrf.mxu0 }
  0xcd   : > { %v1111_v17 = vpop.f32.mrf.mxu1 }
  0xcf   : > { %v661_v18 = vpop.f32.mrf.mxu2 }
  0xd0   : > { %v811_v19 = vpop.f32.mrf.mxu3  ;;  %v689_v44 = vadd.f32 %v661_v18, %v539_v54 }
  0xd2   : > { %v839_v47 = vadd.f32 %v811_v19, %v689_v44 }
  0xd3   : > { %v963_v20 = vpop.f32.mrf.mxu0 }
  0xd4   : > { %v989_v50 = vadd.f32 %v961_v16, %v839_v47 }
  0xd5   : > { %v1113_v21 = vpop.f32.mrf.mxu1 }
  0xd6   : > { %v1139_v56 = vadd.f32 %v1111_v17, %v989_v50 }
  0xd7   : > { %v663_v22 = vpop.f32.mrf.mxu2 }
  0xd8   : > { %v813_v23 = vpop.f32.mrf.mxu3  ;;  %v690_v51 = vadd.f32 %v663_v22, %v540_v60 }
  0xda   : > { %v840_v55 = vadd.f32 %v813_v23, %v690_v51 }
  0xdb   : > { %v966_v24 = vpop.f32.mrf.mxu0 }
  0xdc   : > { %v990_v54 = vadd.f32 %v963_v20, %v840_v55 }
  0xdd   : > { %v1116_v25 = vpop.f32.mrf.mxu1 }
  0xde   : > { %v1140_v5 = vadd.f32 %v1113_v21, %v990_v54 }
  0xdf   : > { %v666_v26 = vpop.f32.mrf.mxu2 }
  0xe0   : > { %v816_v27 = vpop.f32.mrf.mxu3  ;;  %v691_v62 = vadd.f32 %v666_v26, %v541_v6 }
  0xe2   : > { %v841_v60 = vadd.f32 %v816_v27, %v691_v62 }
  0xe3   : > { %v968_v28 = vpop.f32.mrf.mxu0 }
  0xe4   : > { %v991_v6 = vadd.f32 %v966_v24, %v841_v60 }
  0xe5   : > { %v3050_v29 = vpop.f32.mrf.mxu1 }
  0xe6   : > { %v1141_v20 = vadd.f32 %v1116_v25, %v991_v6 }
  0xe7   : > { %v668_v30 = vpop.f32.mrf.mxu2 }
  0xe8   : > { %v818_v31 = vpop.f32.mrf.mxu3  ;;  %v692_v11 = vadd.f32 %v668_v30, %v3046_v12 }
  0xea   : > { %v842_v18 = vadd.f32 %v818_v31, %v692_v11 }
  0xeb   : > { %v3052_v32 = vpop.f32.mrf.mxu0 }
  0xec   : > { %v992_v26 = vadd.f32 %v968_v28, %v842_v18 }
  0xed   : > { %v3054_v33 = vpop.f32.mrf.mxu1 }
  0xee   : > { %v1142_v51 = vadd.f32 %v3050_v29, %v992_v26 }
  0xef   : > { %v671_v34 = vpop.f32.mrf.mxu2 }
  0xf0   : > { %v821_v35 = vpop.f32.mrf.mxu3  ;;  %v693_v27 = vadd.f32 %v671_v34, %v3036_v57 }
  0xf2   : > { %v843_v12 = vadd.f32 %v821_v35, %v693_v27 }
  0xf3   : > { %v3056_v36 = vpop.f32.mrf.mxu0 }
  0xf5   : > { %v3058_v37 = vpop.f32.mrf.mxu1 }
  0xf7   : > { %v3060_v38 = vpop.f32.mrf.mxu2 }
  0xf8   : > { %v3062_v39 = vpop.f32.mrf.mxu3  ;;  %v694_v28 = vadd.f32 %v3060_v38, %v3038_v63 }
  0xfb   : > { %v3064_v40 = vpop.f32.mrf.mxu0 }
  0xfd   : > { %v3066_v41 = vpop.f32.mrf.mxu1 }
  0xff   : > { %v3068_v42 = vpop.f32.mrf.mxu2 }
 0x100   : > { %v3070_v43 = vpop.f32.mrf.mxu3 }
 0x103   : > { %v3072_v45 = vpop.f32.mrf.mxu0 }
 0x105   : > { %v3074_v46 = vpop.f32.mrf.mxu1 }
 0x107   : > { %v3076_v48 = vpop.f32.mrf.mxu2 }
 0x108   : > { %v3078_v49 = vpop.f32.mrf.mxu3 }
 0x10b   : > { %v1561_v52 = vpop.f32.mrf.mxu0 }
 0x10d   : > { %v1718_v53 = vpop.f32.mrf.mxu1 }
 0x10f   : > { %v1261_v58 = vpop.f32.mrf.mxu2 }
 0x110   : > { %v1411_v59 = vpop.f32.mrf.mxu3  ;;  %v1289_v61 = vadd.f32 %v1261_v58, %v1139_v56  ;;  %v844_v56 = vadd.f32 %v3062_v39, %v694_v28 }
 0x112   : > { %v1439_v0 = vadd.f32 %v1411_v59, %v1289_v61  ;;  %v994_v62 = vadd.f32 %v3056_v36, %v844_v56  ;;  %v696_v36 = vadd.f32 %v3076_v48, %v3048_v15 }
 0x113   : > { %v1563_v1 = vpop.f32.mrf.mxu0 }
 0x114   : > { %v1589_v3 = vadd.f32 %v1561_v52, %v1439_v0 }
 0x115   : > { %v1720_v2 = vpop.f32.mrf.mxu1 }
 0x116   : > { %v1738_v4 = vadd.f32 %v1718_v53, %v1589_v3  ;;  %v993_v53 = vadd.f32 %v3052_v32, %v843_v12  ;;  %v695_v32 = vadd.f32 %v3068_v42, %v3044_v9 }
 0x117   : > { %v1263_v7 = vpop.f32.mrf.mxu2 }
 0x118   : > { %v1413_v8 = vpop.f32.mrf.mxu3  ;;  %1762 = vst [vmem:[%s3084_s19] sm:$0xff] %v1738_v4  ;;  %v1290_v10 = vadd.f32 %v1263_v7, %v1140_v5  ;;  %v1143_v29 = vadd.f32 %v3054_v33, %v993_v53  ;;  %v845_v0 = vadd.f32 %v3070_v43, %v695_v32  ;;  %v846_v43 = vadd.f32 %v3078_v49, %v696_v36 }
 0x11a   : > { %v1440_v13 = vadd.f32 %v1413_v8, %v1290_v10  ;;  %v995_v5 = vadd.f32 %v3064_v40, %v845_v0 }
 0x11b   : > { %v1566_v14 = vpop.f32.mrf.mxu0 }
 0x11c   : > { %v1590_v17 = vadd.f32 %v1563_v1, %v1440_v13  ;;  %v1145_v8 = vadd.f32 %v3066_v41, %v995_v5  ;;  %v996_v13 = vadd.f32 %v3072_v45, %v846_v43 }
 0x11d   : > { %v1723_v16 = vpop.f32.mrf.mxu1 }
 0x11e   : > { %v1739_v19 = vadd.f32 %v1720_v2, %v1590_v17  ;;  %v1144_v2 = vadd.f32 %v3058_v37, %v994_v62  ;;  %v1146_v48 = vadd.f32 %v3074_v46, %v996_v13 }
 0x11f   : > { %v1266_v22 = vpop.f32.mrf.mxu2 }
 0x120   : > { %v1416_v23 = vpop.f32.mrf.mxu3  ;;  %1763 = vst [vmem:[%s3084_s19 + $0x8] sm:$0xff] %v1739_v19  ;;  %v1291_v21 = vadd.f32 %v1266_v22, %v1141_v20 }
 0x122   : > { %v1441_v44 = vadd.f32 %v1416_v23, %v1291_v21 }
 0x123   : > { %v1568_v47 = vpop.f32.mrf.mxu0 }
 0x124   : > { %v1591_v24 = vadd.f32 %v1566_v14, %v1441_v44 }
 0x125   : > { %v1725_v50 = vpop.f32.mrf.mxu1 }
 0x126   : > { %v1740_v30 = vadd.f32 %v1723_v16, %v1591_v24 }
 0x127   : > { %v1268_v31 = vpop.f32.mrf.mxu2 }
 0x128   : > { %v1418_v52 = vpop.f32.mrf.mxu3  ;;  %1764 = vst [vmem:[%s3084_s19 + $0x10] sm:$0xff] %v1740_v30  ;;  %v1292_v25 = vadd.f32 %v1268_v31, %v1142_v51 }
 0x12a   : > { %v1442_v55 = vadd.f32 %v1418_v52, %v1292_v25 }
 0x12b   : > { %v1571_v34 = vpop.f32.mrf.mxu0 }
 0x12c   : > { %v1592_v57 = vadd.f32 %v1568_v47, %v1442_v55 }
 0x12d   : > { %v1728_v35 = vpop.f32.mrf.mxu1 }
 0x12e   : > { %v1741_v58 = vadd.f32 %v1725_v50, %v1592_v57 }
 0x12f   : > { %v1271_v59 = vpop.f32.mrf.mxu2 }
 0x130   : > { %v1421_v61 = vpop.f32.mrf.mxu3  ;;  %1765 = vst [vmem:[%s3084_s19 + $0x18] sm:$0xff] %v1741_v58  ;;  %v1293_v54 = vadd.f32 %v1271_v59, %v1143_v29 }
 0x132   : > { %v1443_v63 = vadd.f32 %v1421_v61, %v1293_v54 }
 0x133   : > { %v1573_v39 = vpop.f32.mrf.mxu0 }
 0x134   : > { %v1593_v38 = vadd.f32 %v1571_v34, %v1443_v63 }
 0x135   : > { %v1730_v4 = vpop.f32.mrf.mxu1 }
 0x136   : > { %v1742_v1 = vadd.f32 %v1728_v35, %v1593_v38 }
 0x137   : > { %v1273_v3 = vpop.f32.mrf.mxu2 }
 0x138   : > { %v1423_v33 = vpop.f32.mrf.mxu3  ;;  %1766 = vst [vmem:[%s3084_s19 + $0x20] sm:$0xff] %v1742_v1  ;;  %v1294_v60 = vadd.f32 %v1273_v3, %v1144_v2 }
 0x13a   : > { %v1444_v9 = vadd.f32 %v1423_v33, %v1294_v60 }
 0x13b   : > { %v1576_v11 = vpop.f32.mrf.mxu0 }
 0x13c   : > { %v1594_v42 = vadd.f32 %v1573_v39, %v1444_v9 }
 0x13d   : > { %v1733_v14 = vpop.f32.mrf.mxu1 }
 0x13e   : > { %v1743_v7 = vadd.f32 %v1730_v4, %v1594_v42 }
 0x13f   : > { %v1276_v10 = vpop.f32.mrf.mxu2 }
 0x140   : > { %v1426_v37 = vpop.f32.mrf.mxu3  ;;  %1767 = vst [vmem:[%s3084_s19 + $0x28] sm:$0xff] %v1743_v7  ;;  %v1295_v6 = vadd.f32 %v1276_v10, %v1145_v8 }
 0x142   : > { %v1445_v40 = vadd.f32 %v1426_v37, %v1295_v6 }
 0x143   : > { %v1578_v41 = vpop.f32.mrf.mxu0 }
 0x144   : > { %v1595_v16 = vadd.f32 %v1576_v11, %v1445_v40 }
 0x145   : > { %v1735_v22 = vpop.f32.mrf.mxu1 }
 0x146   : > { %v1744_v15 = vadd.f32 %v1733_v14, %v1595_v16 }
 0x147   : > { %v1278_v17 = vpop.f32.mrf.mxu2 }
 0x148   : > { %1768 = vst [vmem:[%s3084_s19 + $0x30] sm:$0xff] %v1744_v15  ;;  %v1296_v49 = vadd.f32 %v1278_v17, %v1146_v48  ;;  %v1428_v18 = vpop.f32.mrf.mxu3 }
 0x14a   : > { %v1446_v19 = vadd.f32 %v1428_v18, %v1296_v49 }
 0x14c   : > { %v1596_v20 = vadd.f32 %v1578_v41, %v1446_v19 }
 0x14e   : > { %v1745_v23 = vadd.f32 %v1735_v22, %v1596_v20 }
 0x150   : > { %1769 = vst [vmem:[%s3084_s19 + $0x38] sm:$0xff] %v1745_v23 }
 0x151 PF: > { %s14_s17 = sadd.s32 1, %s2697_s17   ;;  %s3128_s15 = smov %s2693_s16 }
 0x152   : > { %p11_p5 = scmp.ge.s32.totalorder %s14_s17, 4   ;;  %s3129_s16 = smov %s3131_s18 }
 0x154   :  { %13 = sbr.rel (!%p11_p5) target bundleno = 2 (0x2), region = 83 }

</bundles_post_ra>
